<compile_context>
chip_gen: v5e
topology: v5e:2x2
jax: 0.10.0
libtpu: 0.0.40
codegen_flags: <defaults>
</compile_context>

<pallas_src>
import functools
import math

import numpy as np
import jax
import jax.numpy as jnp
from jax.experimental import pallas as pl
from jax.experimental.pallas import tpu as pltpu


_SQRT_2_OVER_PI = 0.7978845608028654


def _gelu_tanh(y):
    # TODO(synk): PyTorch nn.GELU default is exact erf; tanh approx drifts ~1e-3 but runs on the EUP.
    return 0.5 * y * (1.0 + jnp.tanh(_SQRT_2_OVER_PI * (y + 0.044715 * y * y * y)))


def _layernorm(x, g, b, eps=1e-5):
    mu = jnp.mean(x, axis=-1, keepdims=True)
    var = jnp.mean(jnp.square(x - mu), axis=-1, keepdims=True)
    return (x - mu) * jax.lax.rsqrt(var + eps) * g + b


# ----------------------------------------------------------------------------- kernel
def _tmixer_kernel(inp_ref, amask_ref, wsq_ref, wqkv_ref, bias_ref, o_ref, *,
                   heads, depth, embed_dim, n_agents, aq_off):
    f32, bf16 = jnp.float32, jnp.bfloat16
    E = embed_dim
    D = 3 * E
    dh = D // heads
    scale = 1.0 / math.sqrt(dh)

    Bblk, T, Cpad = inp_ref.shape
    assert Cpad == D
    M = Bblk * T                                        # batch rows folded into matmul M dim

    inp = inp_ref[...].reshape(M, Cpad)                 # (M, D) f32, [states|hist|aqs|0-pad]
    inp_bf = inp.astype(bf16)
    amask = amask_ref[...]                              # (M, M) additive block-diag attn mask

    # v = calc_v(agent_qs): sum over the agent_qs lanes of the packed input (f32)
    v_tot = jnp.sum(inp[:, aq_off:aq_off + n_agents], axis=-1, keepdims=True)

    # abs() applies only to the state-embedding lanes [0, E)
    abs_mask = jax.lax.broadcasted_iota(jnp.int32, (M, D), 1) < E

    def brow(i, n):                                     # one packed bias/LN row, first n lanes
        return bias_ref[i:i + 1, :n]                    # (1, n) f32

    # --- input embeddings (block-diagonal weight) + bottleneck -------------------
    # TODO(synk): is_noise branch (CUDA noise on states) omitted; args.is_noise=False.
    emb = jnp.dot(inp_bf, wsq_ref[0], preferred_element_type=f32) + brow(0, D)
    emb = jnp.where(abs_mask, jnp.abs(emb), emb)        # abs on s_e lanes only
    x = jnp.dot(emb.astype(bf16), wsq_ref[1], preferred_element_type=f32) + brow(1, D)

    # --- TransformerEncoder (post-norm, relu FFN, dropout = identity) -------------
    src = x
    for l in range(depth):                              # static unroll (t_depth small)
        bl = 6 + 8 * l
        qkv = (jnp.dot(src.astype(bf16), wqkv_ref[l], preferred_element_type=f32)
               + brow(bl + 0, 3 * D))                   # (M, 3D), head-major [q_h|k_h|v_h]
        heads_out = []
        for h in range(heads):
            base = h * 3 * dh                           # contiguous 3*dh lane group per head
            qh = (qkv[:, base:base + dh] * scale).astype(bf16)
            kh = qkv[:, base + dh:base + 2 * dh].astype(bf16)
            vh = qkv[:, base + 2 * dh:base + 3 * dh].astype(bf16)
            s = jax.lax.dot_general(qh, kh, (((1,), (1,)), ((), ())),
                                    preferred_element_type=f32) + amask      # (M, M)
            s = s - jnp.max(s, axis=-1, keepdims=True)
            p = jnp.exp(s)
            p = p * pl.reciprocal(jnp.sum(p, axis=-1, keepdims=True), approx=True)
            heads_out.append(jnp.dot(p.astype(bf16), vh, preferred_element_type=f32))
        # single K=96 out_proj matmul (no per-head partial-sum / MRF drains)
        attn_cat = jnp.concatenate(heads_out, axis=-1).astype(bf16)          # (M, D)
        attn = (jnp.dot(attn_cat, wsq_ref[4 + 3 * l], preferred_element_type=f32)
                + brow(bl + 1, D))
        src = _layernorm(src + attn, brow(bl + 2, D), brow(bl + 3, D))
        ff = jnp.maximum(
            jnp.dot(src.astype(bf16), wsq_ref[5 + 3 * l], preferred_element_type=f32)
            + brow(bl + 4, D), 0.0)                     # ff lanes padded to D (zeros)
        ff = jnp.dot(ff.astype(bf16), wsq_ref[6 + 3 * l], preferred_element_type=f32) \
            + brow(bl + 5, D)
        src = _layernorm(src + ff, brow(bl + 6, D), brow(bl + 7, D))

    # --- q = mixer(x) + x ; q_tot = out(q) * x + v ---------------------------------
    q = src + x
    h1 = _gelu_tanh(jnp.dot(q.astype(bf16), wsq_ref[2], preferred_element_type=f32)
                    + brow(2, D))
    h2 = _gelu_tanh(jnp.dot(h1.astype(bf16), wsq_ref[3], preferred_element_type=f32)
                    + brow(3, D))
    # 1-wide output head as a VPU/XLU reduction (no 1-lane MXU matmul)
    s_out = jnp.sum(h2 * brow(4, D), axis=-1, keepdims=True) + brow(5, 1)     # (M, 1)
    o_ref[...] = (s_out * x + v_tot).reshape(Bblk, T, D)


# ----------------------------------------------------------------------------- packing
def _pad_to(a, rows, cols):
    r, c = a.shape
    return jnp.pad(a, ((0, rows - r), (0, cols - c)))


def pack_params(params, *, heads):
    """Pack the 26 TMixer tensors into 3 slabs (bf16 weights + one f32 bias slab)."""
    E = params["state_w"].shape[1]
    D = 3 * E
    dh = D // heads
    S = params["state_w"].shape[0]
    A = params["aqs_w"].shape[0]
    H = params["hist_w"].shape[0]
    F = params["ff1_w"].shape[-1]
    L = params["in_w"].shape[0]
    D2 = params["o1_w"].shape[1]
    D4 = params["o2_w"].shape[1]
    Cin = S + H + A
    assert Cin <= D and F <= D and D2 <= D and D4 <= D, "packing assumes dims fit in d_model"

    # block-diagonal embedding weight: [states|hist|aqs] @ W -> columns [s_e|h_e|a_e]
    emb = jnp.zeros((D, D), jnp.float32)
    emb = emb.at[:S, 0:E].set(params["state_w"])
    emb = emb.at[S:S + H, E:2 * E].set(params["hist_w"])
    emb = emb.at[S + H:Cin, 2 * E:3 * E].set(params["aqs_w"])

    sq = [emb, params["bot_w"],
          _pad_to(params["o1_w"], D, D), _pad_to(params["o2_w"], D, D)]
    for l in range(L):
        sq += [params["out_w"][l],
               _pad_to(params["ff1_w"][l], D, D),
               _pad_to(params["ff2_w"][l], D, D)]
    w_sq = jnp.stack(sq).astype(jnp.bfloat16)                       # (4+3L, D, D)

    # in_proj columns reordered head-major: [q_h | k_h | v_h] contiguous per head
    def head_major(w, b):
        qw, kw, vw = w[:, :D], w[:, D:2 * D], w[:, 2 * D:]
        qb, kb, vb = b[:, :D], b[:, D:2 * D], b[:, 2 * D:]
        cw, cb = [], []
        for h in range(heads):
            sl = slice(h * dh, (h + 1) * dh)
            cw += [qw[:, sl], kw[:, sl], vw[:, sl]]
            cb += [qb[:, sl], kb[:, sl], vb[:, sl]]
        return jnp.concatenate(cw, 1), jnp.concatenate(cb, 1)

    pairs = [head_major(params["in_w"][l], params["in_b"][l]) for l in range(L)]
    w_qkv = jnp.stack([p[0] for p in pairs]).astype(jnp.bfloat16)   # (L, D, 3D)
    in_bias = [p[1] for p in pairs]

    def row(a):
        a = a.reshape(1, -1)
        return jnp.pad(a, ((0, 0), (0, 3 * D - a.shape[1])))

    rows = [row(jnp.concatenate([params["state_b"], params["hist_b"], params["aqs_b"]], 1)),
            row(params["bot_b"]),
            row(params["o1_b"]), row(params["o2_b"]),
            row(params["o3_w"]), row(params["o3_b"])]
    for l in range(L):
        rows += [row(in_bias[l]), row(params["out_b"][l]),
                 row(params["ln1_g"][l]), row(params["ln1_b"][l]),
                 row(params["ff1_b"][l]), row(params["ff2_b"][l]),
                 row(params["ln2_g"][l]), row(params["ln2_b"][l])]
    biases = jnp.concatenate(rows, 0).astype(jnp.float32)           # (6+8L, 3D)
    return w_sq, w_qkv, biases


# ----------------------------------------------------------------------------- wrapper
def tmixer_forward(packed, agent_qs, hist, states, *, heads,
                   target_rows=128, min_grid_blocks=1):
    w_sq, w_qkv, biases = packed
    B, T, A = agent_qs.shape
    S = states.shape[-1]
    hist2 = hist.reshape(B, T, -1)                       # hist.view(B, T, -1)
    H = hist2.shape[-1]
    D = w_sq.shape[-1]
    L = w_qkv.shape[0]
    NSQ = w_sq.shape[0]
    NB = biases.shape[0]
    Cin = S + H + A
    assert Cin <= D and D % 3 == 0 and D % heads == 0

    # one lane-padded activation slab: [states | hist | agent_qs | 0-pad] -> (B, T, D) f32
    inp = jnp.concatenate([states, hist2, agent_qs], axis=-1)
    inp = jnp.pad(inp, ((0, 0), (0, 0), (0, D - Cin))).astype(jnp.float32)

    # batch folding: Bblk sequences per grid step -> M = Bblk*T matmul rows (target ~128)
    # (on v7x pass min_grid_blocks=2 so both TensorCores get a parallel grid step)
    Bblk = max(1, min(B, max(1, target_rows // T)))
    if min_grid_blocks > 1:
        Bblk = min(Bblk, max(1, B // min_grid_blocks))
    while B % Bblk:
        Bblk -= 1
    nblk = B // Bblk
    M = Bblk * T

    # block-diagonal additive attention mask (identical for every grid step)
    amask = np.kron(np.eye(Bblk, dtype=np.float32), np.ones((T, T), np.float32))
    amask = jnp.asarray((amask - 1.0) * 1e9)             # 0 same-sequence, -1e9 cross-sequence

    kernel = functools.partial(_tmixer_kernel, heads=heads, depth=L,
                               embed_dim=D // 3, n_agents=A, aq_off=S + H)

    return pl.pallas_call(
        kernel,
        grid=(nblk,),
        in_specs=[
            pl.BlockSpec((Bblk, T, D), lambda i: (i, 0, 0)),       # activations
            pl.BlockSpec((M, M), lambda i: (0, 0)),                # attention mask
            pl.BlockSpec((NSQ, D, D), lambda i: (0, 0, 0)),        # square weight slab (bf16)
            pl.BlockSpec((L, D, 3 * D), lambda i: (0, 0, 0)),      # in_proj slab (bf16)
            pl.BlockSpec((NB, 3 * D), lambda i: (0, 0)),           # bias / LN slab (f32)
        ],
        out_specs=pl.BlockSpec((Bblk, T, D), lambda i: (i, 0, 0)),
        out_shape=jax.ShapeDtypeStruct((B, T, D), jnp.float32),
        compiler_params=pltpu.CompilerParams(dimension_semantics=("parallel",)),
    )(inp, amask, w_sq, w_qkv, biases)


# ----------------------------------------------------------------------------- params
def init_params(key, state_dim, n_agents, hist_dim, embed_dim, ff, t_depth):
    dim = embed_dim * 3
    keys = iter(jax.random.split(key, 256))

    def lin(din, dout):
        bound = 1.0 / math.sqrt(din)
        w = jax.random.uniform(next(keys), (din, dout), jnp.float32, -bound, bound)
        b = jax.random.uniform(next(keys), (1, dout), jnp.float32, -bound, bound)
        return w, b

    def stack_lin(din, dout, n):
        ws, bs = zip(*[lin(din, dout) for _ in range(n)])
        return jnp.stack(ws), jnp.stack(bs)              # (n, din, dout), (n, 1, dout)

    p = {}
    p["state_w"], p["state_b"] = lin(state_dim, embed_dim)
    p["aqs_w"], p["aqs_b"] = lin(n_agents, embed_dim)
    p["hist_w"], p["hist_b"] = lin(hist_dim, embed_dim)
    p["bot_w"], p["bot_b"] = lin(dim, dim)

    p["in_w"], p["in_b"] = stack_lin(dim, 3 * dim, t_depth)      # MHA in_proj (Q|K|V)
    p["out_w"], p["out_b"] = stack_lin(dim, dim, t_depth)        # MHA out_proj
    p["ln1_g"] = jnp.ones((t_depth, 1, dim), jnp.float32)
    p["ln1_b"] = jnp.zeros((t_depth, 1, dim), jnp.float32)
    p["ff1_w"], p["ff1_b"] = stack_lin(dim, ff, t_depth)
    p["ff2_w"], p["ff2_b"] = stack_lin(ff, dim, t_depth)
    p["ln2_g"] = jnp.ones((t_depth, 1, dim), jnp.float32)
    p["ln2_b"] = jnp.zeros((t_depth, 1, dim), jnp.float32)

    p["o1_w"], p["o1_b"] = lin(dim, dim // 2)
    p["o2_w"], p["o2_b"] = lin(dim // 2, dim // 4)
    w3, b3 = lin(dim // 4, 1)
    p["o3_w"] = w3.T                                     # (1, dim//4) row for VPU reduction
    p["o3_b"] = b3.reshape(1, 1)                         # scalar bias
    return p


# ----------------------------------------------------------------------------- main
if __name__ == "__main__":
    B, T = 2, 8                       # batch, sequence length
    n_agents = 4
    state_dim = 16                    # prod(args.state_shape)
    rnn_hidden_dim = 8
    embed_dim = 32                    # args.embed_dim -> d_model = 96
    heads = 3                         # args.heads
    ff = 64                           # args.ff
    t_depth = 2                       # args.t_depth
    hist_dim = n_agents * rnn_hidden_dim

    key = jax.random.PRNGKey(0)
    kp, ka, kh, ks = jax.random.split(key, 4)
    params = init_params(kp, state_dim, n_agents, hist_dim, embed_dim, ff, t_depth)
    packed = pack_params(params, heads=heads)            # one-time wrapper-side packing

    agent_qs = jax.random.normal(ka, (B, T, n_agents), jnp.float32)
    hist = jax.random.normal(kh, (B, T, n_agents, rnn_hidden_dim), jnp.float32)
    states = jax.random.normal(ks, (B, T, state_dim), jnp.float32)

    fwd = jax.jit(functools.partial(tmixer_forward, heads=heads))
    q_tot = fwd(packed, agent_qs, hist, states)
    jax.block_until_ready(q_tot)

    assert q_tot.shape == (B, T, embed_dim * 3)
    assert bool(jnp.all(jnp.isfinite(q_tot)))
    print("KERNEL_OK")
</pallas_src>

<mosaic_0001>
module attributes {stable_mosaic.version = 11 : i64} {
  func.func @_tmixer_kernel(%arg0: i32, %arg1: memref<2x8x96xf32, #tpu.memory_space<vmem>>, %arg2: memref<16x16xf32, #tpu.memory_space<vmem>>, %arg3: memref<10x96x96xbf16, #tpu.memory_space<vmem>>, %arg4: memref<2x96x288xbf16, #tpu.memory_space<vmem>>, %arg5: memref<22x288xf32, #tpu.memory_space<vmem>>, %arg6: memref<2x8x96xf32, #tpu.memory_space<vmem>>) attributes {dimension_semantics = [#tpu.dimension_semantics<parallel>], iteration_bounds = array<i64: 1>, scalar_prefetch = 0 : i64, scratch_operands = 0 : i64, tpu.core_type = #tpu.core_type<tc>, window_params = [{transform_indices = @transform_0, window_bounds = array<i64: 2, 8, 96>}, {pipeline_mode = #tpu.pipeline_mode<synchronous>, transform_indices = @transform_1, window_bounds = array<i64: 16, 16>}, {pipeline_mode = #tpu.pipeline_mode<synchronous>, transform_indices = @transform_2, window_bounds = array<i64: 10, 96, 96>}, {pipeline_mode = #tpu.pipeline_mode<synchronous>, transform_indices = @transform_3, window_bounds = array<i64: 2, 96, 288>}, {pipeline_mode = #tpu.pipeline_mode<synchronous>, transform_indices = @transform_4, window_bounds = array<i64: 22, 288>}, {transform_indices = @transform_5, window_bounds = array<i64: 2, 8, 96>}]} {
    %c0 = arith.constant 0 : index
    %c0_0 = arith.constant 0 : index
    %c0_1 = arith.constant 0 : index
    %0 = vector.load %arg1[%c0, %c0_0, %c0_1] : memref<2x8x96xf32, #tpu.memory_space<vmem>>, vector<2x8x96xf32>
    %1 = vector.shape_cast %0 : vector<2x8x96xf32> to vector<16x96xf32>
    %2 = arith.truncf %1 : vector<16x96xf32> to vector<16x96xbf16>
    %c0_2 = arith.constant 0 : index
    %c0_3 = arith.constant 0 : index
    %3 = vector.load %arg2[%c0_2, %c0_3] : memref<16x16xf32, #tpu.memory_space<vmem>>, vector<16x16xf32>
    %4 = vector.extract_strided_slice %1 {offsets = [0, 48], sizes = [16, 4], strides = [1, 1]} : vector<16x96xf32> to vector<16x4xf32>
    %cst = arith.constant dense<0.000000e+00> : vector<16xf32>
    %5 = vector.multi_reduction <add>, %4, %cst [1] : vector<16x4xf32> to vector<16xf32>
    %6 = vector.shape_cast %5 : vector<16xf32> to vector<16x1xf32>
    %7 = tpu.iota {dimensions = array<i32: 1>} : vector<16x96xi32>
    %c32_i32 = arith.constant 32 : i32
    %8 = vector.broadcast %c32_i32 : i32 to vector<16x96xi32>
    %9 = arith.cmpi slt, %7, %8 : vector<16x96xi32>
    %c0_4 = arith.constant 0 : index
    %c0_5 = arith.constant 0 : index
    %c0_6 = arith.constant 0 : index
    %10 = vector.load %arg3[%c0_4, %c0_5, %c0_6] : memref<10x96x96xbf16, #tpu.memory_space<vmem>>, vector<1x96x96xbf16>
    %11 = vector.shape_cast %10 : vector<1x96x96xbf16> to vector<96x96xbf16>
    %cst_7 = arith.constant dense<0.000000e+00> : vector<16x96xf32>
    %12 = tpu.matmul %2, %11, %cst_7 {dimension_numbers = #tpu.dot_dimension_numbers<[1], [0], [0], [1], [0, 0, 1, 1], [], []>} : vector<16x96xbf16>, vector<96x96xbf16>, vector<16x96xf32> -> vector<16x96xf32>
    %c0_8 = arith.constant 0 : index
    %c0_9 = arith.constant 0 : index
    %13 = vector.load %arg5[%c0_8, %c0_9] : memref<22x288xf32, #tpu.memory_space<vmem>>, vector<1x96xf32>
    %14 = vector.broadcast %13 : vector<1x96xf32> to vector<16x96xf32>
    %15 = arith.addf %12, %14 : vector<16x96xf32>
    %16 = math.absf %15 : vector<16x96xf32>
    %17 = arith.select %9, %16, %15 : vector<16x96xi1>, vector<16x96xf32>
    %18 = arith.truncf %17 : vector<16x96xf32> to vector<16x96xbf16>
    %c1 = arith.constant 1 : index
    %c0_10 = arith.constant 0 : index
    %c0_11 = arith.constant 0 : index
    %19 = vector.load %arg3[%c1, %c0_10, %c0_11] : memref<10x96x96xbf16, #tpu.memory_space<vmem>>, vector<1x96x96xbf16>
    %20 = vector.shape_cast %19 : vector<1x96x96xbf16> to vector<96x96xbf16>
    %cst_12 = arith.constant dense<0.000000e+00> : vector<16x96xf32>
    %21 = tpu.matmul %18, %20, %cst_12 {dimension_numbers = #tpu.dot_dimension_numbers<[1], [0], [0], [1], [0, 0, 1, 1], [], []>} : vector<16x96xbf16>, vector<96x96xbf16>, vector<16x96xf32> -> vector<16x96xf32>
    %c1_13 = arith.constant 1 : index
    %c0_14 = arith.constant 0 : index
    %22 = vector.load %arg5[%c1_13, %c0_14] : memref<22x288xf32, #tpu.memory_space<vmem>>, vector<1x96xf32>
    %23 = vector.broadcast %22 : vector<1x96xf32> to vector<16x96xf32>
    %24 = arith.addf %21, %23 : vector<16x96xf32>
    %25 = arith.truncf %24 : vector<16x96xf32> to vector<16x96xbf16>
    %c0_15 = arith.constant 0 : index
    %c0_16 = arith.constant 0 : index
    %c0_17 = arith.constant 0 : index
    %26 = vector.load %arg4[%c0_15, %c0_16, %c0_17] : memref<2x96x288xbf16, #tpu.memory_space<vmem>>, vector<1x96x288xbf16>
    %27 = vector.shape_cast %26 : vector<1x96x288xbf16> to vector<96x288xbf16>
    %cst_18 = arith.constant dense<0.000000e+00> : vector<16x288xf32>
    %28 = tpu.matmul %25, %27, %cst_18 {dimension_numbers = #tpu.dot_dimension_numbers<[1], [0], [0], [1], [0, 0, 1, 1], [], []>} : vector<16x96xbf16>, vector<96x288xbf16>, vector<16x288xf32> -> vector<16x288xf32>
    %c6 = arith.constant 6 : index
    %c0_19 = arith.constant 0 : index
    %29 = vector.load %arg5[%c6, %c0_19] : memref<22x288xf32, #tpu.memory_space<vmem>>, vector<1x288xf32>
    %30 = vector.broadcast %29 : vector<1x288xf32> to vector<16x288xf32>
    %31 = arith.addf %28, %30 : vector<16x288xf32>
    %32 = vector.extract_strided_slice %31 {offsets = [0, 0], sizes = [16, 32], strides = [1, 1]} : vector<16x288xf32> to vector<16x32xf32>
    %cst_20 = arith.constant 0.176776692 : f32
    %33 = vector.broadcast %cst_20 : f32 to vector<16x32xf32>
    %34 = arith.mulf %32, %33 : vector<16x32xf32>
    %35 = arith.truncf %34 : vector<16x32xf32> to vector<16x32xbf16>
    %36 = vector.extract_strided_slice %31 {offsets = [0, 32], sizes = [16, 32], strides = [1, 1]} : vector<16x288xf32> to vector<16x32xf32>
    %37 = arith.truncf %36 : vector<16x32xf32> to vector<16x32xbf16>
    %38 = vector.extract_strided_slice %31 {offsets = [0, 64], sizes = [16, 32], strides = [1, 1]} : vector<16x288xf32> to vector<16x32xf32>
    %39 = arith.truncf %38 : vector<16x32xf32> to vector<16x32xbf16>
    %cst_21 = arith.constant dense<0.000000e+00> : vector<16x16xf32>
    %40 = tpu.matmul %35, %37, %cst_21 {dimension_numbers = #tpu.dot_dimension_numbers<[1], [1], [0], [0], [0, 0, 1, 0], [], []>} : vector<16x32xbf16>, vector<16x32xbf16>, vector<16x16xf32> -> vector<16x16xf32>
    %41 = arith.addf %40, %3 : vector<16x16xf32>
    %cst_22 = arith.constant dense<0xFF800000> : vector<16xf32>
    %42 = vector.multi_reduction <maximumf>, %41, %cst_22 [1] : vector<16x16xf32> to vector<16xf32>
    %43 = vector.shape_cast %42 : vector<16xf32> to vector<16x1xf32>
    %44 = vector.broadcast %43 : vector<16x1xf32> to vector<16x16xf32>
    %45 = arith.subf %41, %44 : vector<16x16xf32>
    %46 = math.exp %45 : vector<16x16xf32>
    %cst_23 = arith.constant dense<0.000000e+00> : vector<16xf32>
    %47 = vector.multi_reduction <add>, %46, %cst_23 [1] : vector<16x16xf32> to vector<16xf32>
    %48 = vector.shape_cast %47 : vector<16xf32> to vector<16x1xf32>
    %49 = tpu.reciprocal %48 {approx = true} : vector<16x1xf32> -> vector<16x1xf32>
    %50 = vector.broadcast %49 : vector<16x1xf32> to vector<16x16xf32>
    %51 = arith.mulf %46, %50 : vector<16x16xf32>
    %52 = arith.truncf %51 : vector<16x16xf32> to vector<16x16xbf16>
    %cst_24 = arith.constant dense<0.000000e+00> : vector<16x32xf32>
    %53 = tpu.matmul %52, %39, %cst_24 {dimension_numbers = #tpu.dot_dimension_numbers<[1], [0], [0], [1], [0, 0, 1, 1], [], []>} : vector<16x16xbf16>, vector<16x32xbf16>, vector<16x32xf32> -> vector<16x32xf32>
    %54 = vector.extract_strided_slice %31 {offsets = [0, 96], sizes = [16, 32], strides = [1, 1]} : vector<16x288xf32> to vector<16x32xf32>
    %cst_25 = arith.constant 0.176776692 : f32
    %55 = vector.broadcast %cst_25 : f32 to vector<16x32xf32>
    %56 = arith.mulf %54, %55 : vector<16x32xf32>
    %57 = arith.truncf %56 : vector<16x32xf32> to vector<16x32xbf16>
    %58 = vector.extract_strided_slice %31 {offsets = [0, 128], sizes = [16, 32], strides = [1, 1]} : vector<16x288xf32> to vector<16x32xf32>
    %59 = arith.truncf %58 : vector<16x32xf32> to vector<16x32xbf16>
    %60 = vector.extract_strided_slice %31 {offsets = [0, 160], sizes = [16, 32], strides = [1, 1]} : vector<16x288xf32> to vector<16x32xf32>
    %61 = arith.truncf %60 : vector<16x32xf32> to vector<16x32xbf16>
    %cst_26 = arith.constant dense<0.000000e+00> : vector<16x16xf32>
    %62 = tpu.matmul %57, %59, %cst_26 {dimension_numbers = #tpu.dot_dimension_numbers<[1], [1], [0], [0], [0, 0, 1, 0], [], []>} : vector<16x32xbf16>, vector<16x32xbf16>, vector<16x16xf32> -> vector<16x16xf32>
    %63 = arith.addf %62, %3 : vector<16x16xf32>
    %cst_27 = arith.constant dense<0xFF800000> : vector<16xf32>
    %64 = vector.multi_reduction <maximumf>, %63, %cst_27 [1] : vector<16x16xf32> to vector<16xf32>
    %65 = vector.shape_cast %64 : vector<16xf32> to vector<16x1xf32>
    %66 = vector.broadcast %65 : vector<16x1xf32> to vector<16x16xf32>
    %67 = arith.subf %63, %66 : vector<16x16xf32>
    %68 = math.exp %67 : vector<16x16xf32>
    %cst_28 = arith.constant dense<0.000000e+00> : vector<16xf32>
    %69 = vector.multi_reduction <add>, %68, %cst_28 [1] : vector<16x16xf32> to vector<16xf32>
    %70 = vector.shape_cast %69 : vector<16xf32> to vector<16x1xf32>
    %71 = tpu.reciprocal %70 {approx = true} : vector<16x1xf32> -> vector<16x1xf32>
    %72 = vector.broadcast %71 : vector<16x1xf32> to vector<16x16xf32>
    %73 = arith.mulf %68, %72 : vector<16x16xf32>
    %74 = arith.truncf %73 : vector<16x16xf32> to vector<16x16xbf16>
    %cst_29 = arith.constant dense<0.000000e+00> : vector<16x32xf32>
    %75 = tpu.matmul %74, %61, %cst_29 {dimension_numbers = #tpu.dot_dimension_numbers<[1], [0], [0], [1], [0, 0, 1, 1], [], []>} : vector<16x16xbf16>, vector<16x32xbf16>, vector<16x32xf32> -> vector<16x32xf32>
    %76 = vector.extract_strided_slice %31 {offsets = [0, 192], sizes = [16, 32], strides = [1, 1]} : vector<16x288xf32> to vector<16x32xf32>
    %cst_30 = arith.constant 0.176776692 : f32
    %77 = vector.broadcast %cst_30 : f32 to vector<16x32xf32>
    %78 = arith.mulf %76, %77 : vector<16x32xf32>
    %79 = arith.truncf %78 : vector<16x32xf32> to vector<16x32xbf16>
    %80 = vector.extract_strided_slice %31 {offsets = [0, 224], sizes = [16, 32], strides = [1, 1]} : vector<16x288xf32> to vector<16x32xf32>
    %81 = arith.truncf %80 : vector<16x32xf32> to vector<16x32xbf16>
    %82 = vector.extract_strided_slice %31 {offsets = [0, 256], sizes = [16, 32], strides = [1, 1]} : vector<16x288xf32> to vector<16x32xf32>
    %83 = arith.truncf %82 : vector<16x32xf32> to vector<16x32xbf16>
    %cst_31 = arith.constant dense<0.000000e+00> : vector<16x16xf32>
    %84 = tpu.matmul %79, %81, %cst_31 {dimension_numbers = #tpu.dot_dimension_numbers<[1], [1], [0], [0], [0, 0, 1, 0], [], []>} : vector<16x32xbf16>, vector<16x32xbf16>, vector<16x16xf32> -> vector<16x16xf32>
    %85 = arith.addf %84, %3 : vector<16x16xf32>
    %cst_32 = arith.constant dense<0xFF800000> : vector<16xf32>
    %86 = vector.multi_reduction <maximumf>, %85, %cst_32 [1] : vector<16x16xf32> to vector<16xf32>
    %87 = vector.shape_cast %86 : vector<16xf32> to vector<16x1xf32>
    %88 = vector.broadcast %87 : vector<16x1xf32> to vector<16x16xf32>
    %89 = arith.subf %85, %88 : vector<16x16xf32>
    %90 = math.exp %89 : vector<16x16xf32>
    %cst_33 = arith.constant dense<0.000000e+00> : vector<16xf32>
    %91 = vector.multi_reduction <add>, %90, %cst_33 [1] : vector<16x16xf32> to vector<16xf32>
    %92 = vector.shape_cast %91 : vector<16xf32> to vector<16x1xf32>
    %93 = tpu.reciprocal %92 {approx = true} : vector<16x1xf32> -> vector<16x1xf32>
    %94 = vector.broadcast %93 : vector<16x1xf32> to vector<16x16xf32>
    %95 = arith.mulf %90, %94 : vector<16x16xf32>
    %96 = arith.truncf %95 : vector<16x16xf32> to vector<16x16xbf16>
    %cst_34 = arith.constant dense<0.000000e+00> : vector<16x32xf32>
    %97 = tpu.matmul %96, %83, %cst_34 {dimension_numbers = #tpu.dot_dimension_numbers<[1], [0], [0], [1], [0, 0, 1, 1], [], []>} : vector<16x16xbf16>, vector<16x32xbf16>, vector<16x32xf32> -> vector<16x32xf32>
    %98 = tpu.concatenate %53, %75, %97 in 1 : vector<16x32xf32>, vector<16x32xf32>, vector<16x32xf32> -> vector<16x96xf32>
    %99 = arith.truncf %98 : vector<16x96xf32> to vector<16x96xbf16>
    %c4 = arith.constant 4 : index
    %c0_35 = arith.constant 0 : index
    %c0_36 = arith.constant 0 : index
    %100 = vector.load %arg3[%c4, %c0_35, %c0_36] : memref<10x96x96xbf16, #tpu.memory_space<vmem>>, vector<1x96x96xbf16>
    %101 = vector.shape_cast %100 : vector<1x96x96xbf16> to vector<96x96xbf16>
    %cst_37 = arith.constant dense<0.000000e+00> : vector<16x96xf32>
    %102 = tpu.matmul %99, %101, %cst_37 {dimension_numbers = #tpu.dot_dimension_numbers<[1], [0], [0], [1], [0, 0, 1, 1], [], []>} : vector<16x96xbf16>, vector<96x96xbf16>, vector<16x96xf32> -> vector<16x96xf32>
    %c7 = arith.constant 7 : index
    %c0_38 = arith.constant 0 : index
    %103 = vector.load %arg5[%c7, %c0_38] : memref<22x288xf32, #tpu.memory_space<vmem>>, vector<1x96xf32>
    %104 = vector.broadcast %103 : vector<1x96xf32> to vector<16x96xf32>
    %105 = arith.addf %102, %104 : vector<16x96xf32>
    %106 = arith.addf %24, %105 : vector<16x96xf32>
    %c8 = arith.constant 8 : index
    %c0_39 = arith.constant 0 : index
    %107 = vector.load %arg5[%c8, %c0_39] : memref<22x288xf32, #tpu.memory_space<vmem>>, vector<1x96xf32>
    %c9 = arith.constant 9 : index
    %c0_40 = arith.constant 0 : index
    %108 = vector.load %arg5[%c9, %c0_40] : memref<22x288xf32, #tpu.memory_space<vmem>>, vector<1x96xf32>
    %cst_41 = arith.constant dense<0.000000e+00> : vector<16xf32>
    %109 = vector.multi_reduction <add>, %106, %cst_41 [1] : vector<16x96xf32> to vector<16xf32>
    %110 = vector.shape_cast %109 : vector<16xf32> to vector<16x1xf32>
    %cst_42 = arith.constant 9.600000e+01 : f32
    %111 = vector.broadcast %cst_42 : f32 to vector<16x1xf32>
    %112 = arith.divf %110, %111 : vector<16x1xf32>
    %113 = vector.broadcast %112 : vector<16x1xf32> to vector<16x96xf32>
    %114 = arith.subf %106, %113 : vector<16x96xf32>
    %115 = arith.mulf %114, %114 : vector<16x96xf32>
    %cst_43 = arith.constant dense<0.000000e+00> : vector<16xf32>
    %116 = vector.multi_reduction <add>, %115, %cst_43 [1] : vector<16x96xf32> to vector<16xf32>
    %117 = vector.shape_cast %116 : vector<16xf32> to vector<16x1xf32>
    %cst_44 = arith.constant 9.600000e+01 : f32
    %118 = vector.broadcast %cst_44 : f32 to vector<16x1xf32>
    %119 = arith.divf %117, %118 : vector<16x1xf32>
    %120 = vector.broadcast %112 : vector<16x1xf32> to vector<16x96xf32>
    %121 = arith.subf %106, %120 : vector<16x96xf32>
    %cst_45 = arith.constant 9.99999974E-6 : f32
    %122 = vector.broadcast %cst_45 : f32 to vector<16x1xf32>
    %123 = arith.addf %119, %122 : vector<16x1xf32>
    %124 = math.rsqrt %123 : vector<16x1xf32>
    %125 = vector.broadcast %124 : vector<16x1xf32> to vector<16x96xf32>
    %126 = arith.mulf %121, %125 : vector<16x96xf32>
    %127 = vector.broadcast %107 : vector<1x96xf32> to vector<16x96xf32>
    %128 = arith.mulf %126, %127 : vector<16x96xf32>
    %129 = vector.broadcast %108 : vector<1x96xf32> to vector<16x96xf32>
    %130 = arith.addf %128, %129 : vector<16x96xf32>
    %131 = arith.truncf %130 : vector<16x96xf32> to vector<16x96xbf16>
    %c5 = arith.constant 5 : index
    %c0_46 = arith.constant 0 : index
    %c0_47 = arith.constant 0 : index
    %132 = vector.load %arg3[%c5, %c0_46, %c0_47] : memref<10x96x96xbf16, #tpu.memory_space<vmem>>, vector<1x96x96xbf16>
    %133 = vector.shape_cast %132 : vector<1x96x96xbf16> to vector<96x96xbf16>
    %cst_48 = arith.constant dense<0.000000e+00> : vector<16x96xf32>
    %134 = tpu.matmul %131, %133, %cst_48 {dimension_numbers = #tpu.dot_dimension_numbers<[1], [0], [0], [1], [0, 0, 1, 1], [], []>} : vector<16x96xbf16>, vector<96x96xbf16>, vector<16x96xf32> -> vector<16x96xf32>
    %c10 = arith.constant 10 : index
    %c0_49 = arith.constant 0 : index
    %135 = vector.load %arg5[%c10, %c0_49] : memref<22x288xf32, #tpu.memory_space<vmem>>, vector<1x96xf32>
    %136 = vector.broadcast %135 : vector<1x96xf32> to vector<16x96xf32>
    %137 = arith.addf %134, %136 : vector<16x96xf32>
    %cst_50 = arith.constant 0.000000e+00 : f32
    %138 = vector.broadcast %cst_50 : f32 to vector<16x96xf32>
    %139 = arith.maximumf %137, %138 : vector<16x96xf32>
    %140 = arith.truncf %139 : vector<16x96xf32> to vector<16x96xbf16>
    %c6_51 = arith.constant 6 : index
    %c0_52 = arith.constant 0 : index
    %c0_53 = arith.constant 0 : index
    %141 = vector.load %arg3[%c6_51, %c0_52, %c0_53] : memref<10x96x96xbf16, #tpu.memory_space<vmem>>, vector<1x96x96xbf16>
    %142 = vector.shape_cast %141 : vector<1x96x96xbf16> to vector<96x96xbf16>
    %cst_54 = arith.constant dense<0.000000e+00> : vector<16x96xf32>
    %143 = tpu.matmul %140, %142, %cst_54 {dimension_numbers = #tpu.dot_dimension_numbers<[1], [0], [0], [1], [0, 0, 1, 1], [], []>} : vector<16x96xbf16>, vector<96x96xbf16>, vector<16x96xf32> -> vector<16x96xf32>
    %c11 = arith.constant 11 : index
    %c0_55 = arith.constant 0 : index
    %144 = vector.load %arg5[%c11, %c0_55] : memref<22x288xf32, #tpu.memory_space<vmem>>, vector<1x96xf32>
    %145 = vector.broadcast %144 : vector<1x96xf32> to vector<16x96xf32>
    %146 = arith.addf %143, %145 : vector<16x96xf32>
    %147 = arith.addf %130, %146 : vector<16x96xf32>
    %c12 = arith.constant 12 : index
    %c0_56 = arith.constant 0 : index
    %148 = vector.load %arg5[%c12, %c0_56] : memref<22x288xf32, #tpu.memory_space<vmem>>, vector<1x96xf32>
    %c13 = arith.constant 13 : index
    %c0_57 = arith.constant 0 : index
    %149 = vector.load %arg5[%c13, %c0_57] : memref<22x288xf32, #tpu.memory_space<vmem>>, vector<1x96xf32>
    %cst_58 = arith.constant dense<0.000000e+00> : vector<16xf32>
    %150 = vector.multi_reduction <add>, %147, %cst_58 [1] : vector<16x96xf32> to vector<16xf32>
    %151 = vector.shape_cast %150 : vector<16xf32> to vector<16x1xf32>
    %cst_59 = arith.constant 9.600000e+01 : f32
    %152 = vector.broadcast %cst_59 : f32 to vector<16x1xf32>
    %153 = arith.divf %151, %152 : vector<16x1xf32>
    %154 = vector.broadcast %153 : vector<16x1xf32> to vector<16x96xf32>
    %155 = arith.subf %147, %154 : vector<16x96xf32>
    %156 = arith.mulf %155, %155 : vector<16x96xf32>
    %cst_60 = arith.constant dense<0.000000e+00> : vector<16xf32>
    %157 = vector.multi_reduction <add>, %156, %cst_60 [1] : vector<16x96xf32> to vector<16xf32>
    %158 = vector.shape_cast %157 : vector<16xf32> to vector<16x1xf32>
    %cst_61 = arith.constant 9.600000e+01 : f32
    %159 = vector.broadcast %cst_61 : f32 to vector<16x1xf32>
    %160 = arith.divf %158, %159 : vector<16x1xf32>
    %161 = vector.broadcast %153 : vector<16x1xf32> to vector<16x96xf32>
    %162 = arith.subf %147, %161 : vector<16x96xf32>
    %cst_62 = arith.constant 9.99999974E-6 : f32
    %163 = vector.broadcast %cst_62 : f32 to vector<16x1xf32>
    %164 = arith.addf %160, %163 : vector<16x1xf32>
    %165 = math.rsqrt %164 : vector<16x1xf32>
    %166 = vector.broadcast %165 : vector<16x1xf32> to vector<16x96xf32>
    %167 = arith.mulf %162, %166 : vector<16x96xf32>
    %168 = vector.broadcast %148 : vector<1x96xf32> to vector<16x96xf32>
    %169 = arith.mulf %167, %168 : vector<16x96xf32>
    %170 = vector.broadcast %149 : vector<1x96xf32> to vector<16x96xf32>
    %171 = arith.addf %169, %170 : vector<16x96xf32>
    %172 = arith.truncf %171 : vector<16x96xf32> to vector<16x96xbf16>
    %c1_63 = arith.constant 1 : index
    %c0_64 = arith.constant 0 : index
    %c0_65 = arith.constant 0 : index
    %173 = vector.load %arg4[%c1_63, %c0_64, %c0_65] : memref<2x96x288xbf16, #tpu.memory_space<vmem>>, vector<1x96x288xbf16>
    %174 = vector.shape_cast %173 : vector<1x96x288xbf16> to vector<96x288xbf16>
    %cst_66 = arith.constant dense<0.000000e+00> : vector<16x288xf32>
    %175 = tpu.matmul %172, %174, %cst_66 {dimension_numbers = #tpu.dot_dimension_numbers<[1], [0], [0], [1], [0, 0, 1, 1], [], []>} : vector<16x96xbf16>, vector<96x288xbf16>, vector<16x288xf32> -> vector<16x288xf32>
    %c14 = arith.constant 14 : index
    %c0_67 = arith.constant 0 : index
    %176 = vector.load %arg5[%c14, %c0_67] : memref<22x288xf32, #tpu.memory_space<vmem>>, vector<1x288xf32>
    %177 = vector.broadcast %176 : vector<1x288xf32> to vector<16x288xf32>
    %178 = arith.addf %175, %177 : vector<16x288xf32>
    %179 = vector.extract_strided_slice %178 {offsets = [0, 0], sizes = [16, 32], strides = [1, 1]} : vector<16x288xf32> to vector<16x32xf32>
    %cst_68 = arith.constant 0.176776692 : f32
    %180 = vector.broadcast %cst_68 : f32 to vector<16x32xf32>
    %181 = arith.mulf %179, %180 : vector<16x32xf32>
    %182 = arith.truncf %181 : vector<16x32xf32> to vector<16x32xbf16>
    %183 = vector.extract_strided_slice %178 {offsets = [0, 32], sizes = [16, 32], strides = [1, 1]} : vector<16x288xf32> to vector<16x32xf32>
    %184 = arith.truncf %183 : vector<16x32xf32> to vector<16x32xbf16>
    %185 = vector.extract_strided_slice %178 {offsets = [0, 64], sizes = [16, 32], strides = [1, 1]} : vector<16x288xf32> to vector<16x32xf32>
    %186 = arith.truncf %185 : vector<16x32xf32> to vector<16x32xbf16>
    %cst_69 = arith.constant dense<0.000000e+00> : vector<16x16xf32>
    %187 = tpu.matmul %182, %184, %cst_69 {dimension_numbers = #tpu.dot_dimension_numbers<[1], [1], [0], [0], [0, 0, 1, 0], [], []>} : vector<16x32xbf16>, vector<16x32xbf16>, vector<16x16xf32> -> vector<16x16xf32>
    %188 = arith.addf %187, %3 : vector<16x16xf32>
    %cst_70 = arith.constant dense<0xFF800000> : vector<16xf32>
    %189 = vector.multi_reduction <maximumf>, %188, %cst_70 [1] : vector<16x16xf32> to vector<16xf32>
    %190 = vector.shape_cast %189 : vector<16xf32> to vector<16x1xf32>
    %191 = vector.broadcast %190 : vector<16x1xf32> to vector<16x16xf32>
    %192 = arith.subf %188, %191 : vector<16x16xf32>
    %193 = math.exp %192 : vector<16x16xf32>
    %cst_71 = arith.constant dense<0.000000e+00> : vector<16xf32>
    %194 = vector.multi_reduction <add>, %193, %cst_71 [1] : vector<16x16xf32> to vector<16xf32>
    %195 = vector.shape_cast %194 : vector<16xf32> to vector<16x1xf32>
    %196 = tpu.reciprocal %195 {approx = true} : vector<16x1xf32> -> vector<16x1xf32>
    %197 = vector.broadcast %196 : vector<16x1xf32> to vector<16x16xf32>
    %198 = arith.mulf %193, %197 : vector<16x16xf32>
    %199 = arith.truncf %198 : vector<16x16xf32> to vector<16x16xbf16>
    %cst_72 = arith.constant dense<0.000000e+00> : vector<16x32xf32>
    %200 = tpu.matmul %199, %186, %cst_72 {dimension_numbers = #tpu.dot_dimension_numbers<[1], [0], [0], [1], [0, 0, 1, 1], [], []>} : vector<16x16xbf16>, vector<16x32xbf16>, vector<16x32xf32> -> vector<16x32xf32>
    %201 = vector.extract_strided_slice %178 {offsets = [0, 96], sizes = [16, 32], strides = [1, 1]} : vector<16x288xf32> to vector<16x32xf32>
    %cst_73 = arith.constant 0.176776692 : f32
    %202 = vector.broadcast %cst_73 : f32 to vector<16x32xf32>
    %203 = arith.mulf %201, %202 : vector<16x32xf32>
    %204 = arith.truncf %203 : vector<16x32xf32> to vector<16x32xbf16>
    %205 = vector.extract_strided_slice %178 {offsets = [0, 128], sizes = [16, 32], strides = [1, 1]} : vector<16x288xf32> to vector<16x32xf32>
    %206 = arith.truncf %205 : vector<16x32xf32> to vector<16x32xbf16>
    %207 = vector.extract_strided_slice %178 {offsets = [0, 160], sizes = [16, 32], strides = [1, 1]} : vector<16x288xf32> to vector<16x32xf32>
    %208 = arith.truncf %207 : vector<16x32xf32> to vector<16x32xbf16>
    %cst_74 = arith.constant dense<0.000000e+00> : vector<16x16xf32>
    %209 = tpu.matmul %204, %206, %cst_74 {dimension_numbers = #tpu.dot_dimension_numbers<[1], [1], [0], [0], [0, 0, 1, 0], [], []>} : vector<16x32xbf16>, vector<16x32xbf16>, vector<16x16xf32> -> vector<16x16xf32>
    %210 = arith.addf %209, %3 : vector<16x16xf32>
    %cst_75 = arith.constant dense<0xFF800000> : vector<16xf32>
    %211 = vector.multi_reduction <maximumf>, %210, %cst_75 [1] : vector<16x16xf32> to vector<16xf32>
    %212 = vector.shape_cast %211 : vector<16xf32> to vector<16x1xf32>
    %213 = vector.broadcast %212 : vector<16x1xf32> to vector<16x16xf32>
    %214 = arith.subf %210, %213 : vector<16x16xf32>
    %215 = math.exp %214 : vector<16x16xf32>
    %cst_76 = arith.constant dense<0.000000e+00> : vector<16xf32>
    %216 = vector.multi_reduction <add>, %215, %cst_76 [1] : vector<16x16xf32> to vector<16xf32>
    %217 = vector.shape_cast %216 : vector<16xf32> to vector<16x1xf32>
    %218 = tpu.reciprocal %217 {approx = true} : vector<16x1xf32> -> vector<16x1xf32>
    %219 = vector.broadcast %218 : vector<16x1xf32> to vector<16x16xf32>
    %220 = arith.mulf %215, %219 : vector<16x16xf32>
    %221 = arith.truncf %220 : vector<16x16xf32> to vector<16x16xbf16>
    %cst_77 = arith.constant dense<0.000000e+00> : vector<16x32xf32>
    %222 = tpu.matmul %221, %208, %cst_77 {dimension_numbers = #tpu.dot_dimension_numbers<[1], [0], [0], [1], [0, 0, 1, 1], [], []>} : vector<16x16xbf16>, vector<16x32xbf16>, vector<16x32xf32> -> vector<16x32xf32>
    %223 = vector.extract_strided_slice %178 {offsets = [0, 192], sizes = [16, 32], strides = [1, 1]} : vector<16x288xf32> to vector<16x32xf32>
    %cst_78 = arith.constant 0.176776692 : f32
    %224 = vector.broadcast %cst_78 : f32 to vector<16x32xf32>
    %225 = arith.mulf %223, %224 : vector<16x32xf32>
    %226 = arith.truncf %225 : vector<16x32xf32> to vector<16x32xbf16>
    %227 = vector.extract_strided_slice %178 {offsets = [0, 224], sizes = [16, 32], strides = [1, 1]} : vector<16x288xf32> to vector<16x32xf32>
    %228 = arith.truncf %227 : vector<16x32xf32> to vector<16x32xbf16>
    %229 = vector.extract_strided_slice %178 {offsets = [0, 256], sizes = [16, 32], strides = [1, 1]} : vector<16x288xf32> to vector<16x32xf32>
    %230 = arith.truncf %229 : vector<16x32xf32> to vector<16x32xbf16>
    %cst_79 = arith.constant dense<0.000000e+00> : vector<16x16xf32>
    %231 = tpu.matmul %226, %228, %cst_79 {dimension_numbers = #tpu.dot_dimension_numbers<[1], [1], [0], [0], [0, 0, 1, 0], [], []>} : vector<16x32xbf16>, vector<16x32xbf16>, vector<16x16xf32> -> vector<16x16xf32>
    %232 = arith.addf %231, %3 : vector<16x16xf32>
    %cst_80 = arith.constant dense<0xFF800000> : vector<16xf32>
    %233 = vector.multi_reduction <maximumf>, %232, %cst_80 [1] : vector<16x16xf32> to vector<16xf32>
    %234 = vector.shape_cast %233 : vector<16xf32> to vector<16x1xf32>
    %235 = vector.broadcast %234 : vector<16x1xf32> to vector<16x16xf32>
    %236 = arith.subf %232, %235 : vector<16x16xf32>
    %237 = math.exp %236 : vector<16x16xf32>
    %cst_81 = arith.constant dense<0.000000e+00> : vector<16xf32>
    %238 = vector.multi_reduction <add>, %237, %cst_81 [1] : vector<16x16xf32> to vector<16xf32>
    %239 = vector.shape_cast %238 : vector<16xf32> to vector<16x1xf32>
    %240 = tpu.reciprocal %239 {approx = true} : vector<16x1xf32> -> vector<16x1xf32>
    %241 = vector.broadcast %240 : vector<16x1xf32> to vector<16x16xf32>
    %242 = arith.mulf %237, %241 : vector<16x16xf32>
    %243 = arith.truncf %242 : vector<16x16xf32> to vector<16x16xbf16>
    %cst_82 = arith.constant dense<0.000000e+00> : vector<16x32xf32>
    %244 = tpu.matmul %243, %230, %cst_82 {dimension_numbers = #tpu.dot_dimension_numbers<[1], [0], [0], [1], [0, 0, 1, 1], [], []>} : vector<16x16xbf16>, vector<16x32xbf16>, vector<16x32xf32> -> vector<16x32xf32>
    %245 = tpu.concatenate %200, %222, %244 in 1 : vector<16x32xf32>, vector<16x32xf32>, vector<16x32xf32> -> vector<16x96xf32>
    %246 = arith.truncf %245 : vector<16x96xf32> to vector<16x96xbf16>
    %c7_83 = arith.constant 7 : index
    %c0_84 = arith.constant 0 : index
    %c0_85 = arith.constant 0 : index
    %247 = vector.load %arg3[%c7_83, %c0_84, %c0_85] : memref<10x96x96xbf16, #tpu.memory_space<vmem>>, vector<1x96x96xbf16>
    %248 = vector.shape_cast %247 : vector<1x96x96xbf16> to vector<96x96xbf16>
    %cst_86 = arith.constant dense<0.000000e+00> : vector<16x96xf32>
    %249 = tpu.matmul %246, %248, %cst_86 {dimension_numbers = #tpu.dot_dimension_numbers<[1], [0], [0], [1], [0, 0, 1, 1], [], []>} : vector<16x96xbf16>, vector<96x96xbf16>, vector<16x96xf32> -> vector<16x96xf32>
    %c15 = arith.constant 15 : index
    %c0_87 = arith.constant 0 : index
    %250 = vector.load %arg5[%c15, %c0_87] : memref<22x288xf32, #tpu.memory_space<vmem>>, vector<1x96xf32>
    %251 = vector.broadcast %250 : vector<1x96xf32> to vector<16x96xf32>
    %252 = arith.addf %249, %251 : vector<16x96xf32>
    %253 = arith.addf %171, %252 : vector<16x96xf32>
    %c16 = arith.constant 16 : index
    %c0_88 = arith.constant 0 : index
    %254 = vector.load %arg5[%c16, %c0_88] : memref<22x288xf32, #tpu.memory_space<vmem>>, vector<1x96xf32>
    %c17 = arith.constant 17 : index
    %c0_89 = arith.constant 0 : index
    %255 = vector.load %arg5[%c17, %c0_89] : memref<22x288xf32, #tpu.memory_space<vmem>>, vector<1x96xf32>
    %cst_90 = arith.constant dense<0.000000e+00> : vector<16xf32>
    %256 = vector.multi_reduction <add>, %253, %cst_90 [1] : vector<16x96xf32> to vector<16xf32>
    %257 = vector.shape_cast %256 : vector<16xf32> to vector<16x1xf32>
    %cst_91 = arith.constant 9.600000e+01 : f32
    %258 = vector.broadcast %cst_91 : f32 to vector<16x1xf32>
    %259 = arith.divf %257, %258 : vector<16x1xf32>
    %260 = vector.broadcast %259 : vector<16x1xf32> to vector<16x96xf32>
    %261 = arith.subf %253, %260 : vector<16x96xf32>
    %262 = arith.mulf %261, %261 : vector<16x96xf32>
    %cst_92 = arith.constant dense<0.000000e+00> : vector<16xf32>
    %263 = vector.multi_reduction <add>, %262, %cst_92 [1] : vector<16x96xf32> to vector<16xf32>
    %264 = vector.shape_cast %263 : vector<16xf32> to vector<16x1xf32>
    %cst_93 = arith.constant 9.600000e+01 : f32
    %265 = vector.broadcast %cst_93 : f32 to vector<16x1xf32>
    %266 = arith.divf %264, %265 : vector<16x1xf32>
    %267 = vector.broadcast %259 : vector<16x1xf32> to vector<16x96xf32>
    %268 = arith.subf %253, %267 : vector<16x96xf32>
    %cst_94 = arith.constant 9.99999974E-6 : f32
    %269 = vector.broadcast %cst_94 : f32 to vector<16x1xf32>
    %270 = arith.addf %266, %269 : vector<16x1xf32>
    %271 = math.rsqrt %270 : vector<16x1xf32>
    %272 = vector.broadcast %271 : vector<16x1xf32> to vector<16x96xf32>
    %273 = arith.mulf %268, %272 : vector<16x96xf32>
    %274 = vector.broadcast %254 : vector<1x96xf32> to vector<16x96xf32>
    %275 = arith.mulf %273, %274 : vector<16x96xf32>
    %276 = vector.broadcast %255 : vector<1x96xf32> to vector<16x96xf32>
    %277 = arith.addf %275, %276 : vector<16x96xf32>
    %278 = arith.truncf %277 : vector<16x96xf32> to vector<16x96xbf16>
    %c8_95 = arith.constant 8 : index
    %c0_96 = arith.constant 0 : index
    %c0_97 = arith.constant 0 : index
    %279 = vector.load %arg3[%c8_95, %c0_96, %c0_97] : memref<10x96x96xbf16, #tpu.memory_space<vmem>>, vector<1x96x96xbf16>
    %280 = vector.shape_cast %279 : vector<1x96x96xbf16> to vector<96x96xbf16>
    %cst_98 = arith.constant dense<0.000000e+00> : vector<16x96xf32>
    %281 = tpu.matmul %278, %280, %cst_98 {dimension_numbers = #tpu.dot_dimension_numbers<[1], [0], [0], [1], [0, 0, 1, 1], [], []>} : vector<16x96xbf16>, vector<96x96xbf16>, vector<16x96xf32> -> vector<16x96xf32>
    %c18 = arith.constant 18 : index
    %c0_99 = arith.constant 0 : index
    %282 = vector.load %arg5[%c18, %c0_99] : memref<22x288xf32, #tpu.memory_space<vmem>>, vector<1x96xf32>
    %283 = vector.broadcast %282 : vector<1x96xf32> to vector<16x96xf32>
    %284 = arith.addf %281, %283 : vector<16x96xf32>
    %cst_100 = arith.constant 0.000000e+00 : f32
    %285 = vector.broadcast %cst_100 : f32 to vector<16x96xf32>
    %286 = arith.maximumf %284, %285 : vector<16x96xf32>
    %287 = arith.truncf %286 : vector<16x96xf32> to vector<16x96xbf16>
    %c9_101 = arith.constant 9 : index
    %c0_102 = arith.constant 0 : index
    %c0_103 = arith.constant 0 : index
    %288 = vector.load %arg3[%c9_101, %c0_102, %c0_103] : memref<10x96x96xbf16, #tpu.memory_space<vmem>>, vector<1x96x96xbf16>
    %289 = vector.shape_cast %288 : vector<1x96x96xbf16> to vector<96x96xbf16>
    %cst_104 = arith.constant dense<0.000000e+00> : vector<16x96xf32>
    %290 = tpu.matmul %287, %289, %cst_104 {dimension_numbers = #tpu.dot_dimension_numbers<[1], [0], [0], [1], [0, 0, 1, 1], [], []>} : vector<16x96xbf16>, vector<96x96xbf16>, vector<16x96xf32> -> vector<16x96xf32>
    %c19 = arith.constant 19 : index
    %c0_105 = arith.constant 0 : index
    %291 = vector.load %arg5[%c19, %c0_105] : memref<22x288xf32, #tpu.memory_space<vmem>>, vector<1x96xf32>
    %292 = vector.broadcast %291 : vector<1x96xf32> to vector<16x96xf32>
    %293 = arith.addf %290, %292 : vector<16x96xf32>
    %294 = arith.addf %277, %293 : vector<16x96xf32>
    %c20 = arith.constant 20 : index
    %c0_106 = arith.constant 0 : index
    %295 = vector.load %arg5[%c20, %c0_106] : memref<22x288xf32, #tpu.memory_space<vmem>>, vector<1x96xf32>
    %c21 = arith.constant 21 : index
    %c0_107 = arith.constant 0 : index
    %296 = vector.load %arg5[%c21, %c0_107] : memref<22x288xf32, #tpu.memory_space<vmem>>, vector<1x96xf32>
    %cst_108 = arith.constant dense<0.000000e+00> : vector<16xf32>
    %297 = vector.multi_reduction <add>, %294, %cst_108 [1] : vector<16x96xf32> to vector<16xf32>
    %298 = vector.shape_cast %297 : vector<16xf32> to vector<16x1xf32>
    %cst_109 = arith.constant 9.600000e+01 : f32
    %299 = vector.broadcast %cst_109 : f32 to vector<16x1xf32>
    %300 = arith.divf %298, %299 : vector<16x1xf32>
    %301 = vector.broadcast %300 : vector<16x1xf32> to vector<16x96xf32>
    %302 = arith.subf %294, %301 : vector<16x96xf32>
    %303 = arith.mulf %302, %302 : vector<16x96xf32>
    %cst_110 = arith.constant dense<0.000000e+00> : vector<16xf32>
    %304 = vector.multi_reduction <add>, %303, %cst_110 [1] : vector<16x96xf32> to vector<16xf32>
    %305 = vector.shape_cast %304 : vector<16xf32> to vector<16x1xf32>
    %cst_111 = arith.constant 9.600000e+01 : f32
    %306 = vector.broadcast %cst_111 : f32 to vector<16x1xf32>
    %307 = arith.divf %305, %306 : vector<16x1xf32>
    %308 = vector.broadcast %300 : vector<16x1xf32> to vector<16x96xf32>
    %309 = arith.subf %294, %308 : vector<16x96xf32>
    %cst_112 = arith.constant 9.99999974E-6 : f32
    %310 = vector.broadcast %cst_112 : f32 to vector<16x1xf32>
    %311 = arith.addf %307, %310 : vector<16x1xf32>
    %312 = math.rsqrt %311 : vector<16x1xf32>
    %313 = vector.broadcast %312 : vector<16x1xf32> to vector<16x96xf32>
    %314 = arith.mulf %309, %313 : vector<16x96xf32>
    %315 = vector.broadcast %295 : vector<1x96xf32> to vector<16x96xf32>
    %316 = arith.mulf %314, %315 : vector<16x96xf32>
    %317 = vector.broadcast %296 : vector<1x96xf32> to vector<16x96xf32>
    %318 = arith.addf %316, %317 : vector<16x96xf32>
    %319 = arith.addf %318, %24 : vector<16x96xf32>
    %320 = arith.truncf %319 : vector<16x96xf32> to vector<16x96xbf16>
    %c2 = arith.constant 2 : index
    %c0_113 = arith.constant 0 : index
    %c0_114 = arith.constant 0 : index
    %321 = vector.load %arg3[%c2, %c0_113, %c0_114] : memref<10x96x96xbf16, #tpu.memory_space<vmem>>, vector<1x96x96xbf16>
    %322 = vector.shape_cast %321 : vector<1x96x96xbf16> to vector<96x96xbf16>
    %cst_115 = arith.constant dense<0.000000e+00> : vector<16x96xf32>
    %323 = tpu.matmul %320, %322, %cst_115 {dimension_numbers = #tpu.dot_dimension_numbers<[1], [0], [0], [1], [0, 0, 1, 1], [], []>} : vector<16x96xbf16>, vector<96x96xbf16>, vector<16x96xf32> -> vector<16x96xf32>
    %c2_116 = arith.constant 2 : index
    %c0_117 = arith.constant 0 : index
    %324 = vector.load %arg5[%c2_116, %c0_117] : memref<22x288xf32, #tpu.memory_space<vmem>>, vector<1x96xf32>
    %325 = vector.broadcast %324 : vector<1x96xf32> to vector<16x96xf32>
    %326 = arith.addf %323, %325 : vector<16x96xf32>
    %cst_118 = arith.constant 5.000000e-01 : f32
    %327 = vector.broadcast %cst_118 : f32 to vector<16x96xf32>
    %328 = arith.mulf %327, %326 : vector<16x96xf32>
    %cst_119 = arith.constant 4.471500e-02 : f32
    %329 = vector.broadcast %cst_119 : f32 to vector<16x96xf32>
    %330 = arith.mulf %329, %326 : vector<16x96xf32>
    %331 = arith.mulf %330, %326 : vector<16x96xf32>
    %332 = arith.mulf %331, %326 : vector<16x96xf32>
    %333 = arith.addf %326, %332 : vector<16x96xf32>
    %cst_120 = arith.constant 0.797884583 : f32
    %334 = vector.broadcast %cst_120 : f32 to vector<16x96xf32>
    %335 = arith.mulf %334, %333 : vector<16x96xf32>
    %336 = math.tanh %335 : vector<16x96xf32>
    %cst_121 = arith.constant 1.000000e+00 : f32
    %337 = vector.broadcast %cst_121 : f32 to vector<16x96xf32>
    %338 = arith.addf %337, %336 : vector<16x96xf32>
    %339 = arith.mulf %328, %338 : vector<16x96xf32>
    %340 = arith.truncf %339 : vector<16x96xf32> to vector<16x96xbf16>
    %c3 = arith.constant 3 : index
    %c0_122 = arith.constant 0 : index
    %c0_123 = arith.constant 0 : index
    %341 = vector.load %arg3[%c3, %c0_122, %c0_123] : memref<10x96x96xbf16, #tpu.memory_space<vmem>>, vector<1x96x96xbf16>
    %342 = vector.shape_cast %341 : vector<1x96x96xbf16> to vector<96x96xbf16>
    %cst_124 = arith.constant dense<0.000000e+00> : vector<16x96xf32>
    %343 = tpu.matmul %340, %342, %cst_124 {dimension_numbers = #tpu.dot_dimension_numbers<[1], [0], [0], [1], [0, 0, 1, 1], [], []>} : vector<16x96xbf16>, vector<96x96xbf16>, vector<16x96xf32> -> vector<16x96xf32>
    %c3_125 = arith.constant 3 : index
    %c0_126 = arith.constant 0 : index
    %344 = vector.load %arg5[%c3_125, %c0_126] : memref<22x288xf32, #tpu.memory_space<vmem>>, vector<1x96xf32>
    %345 = vector.broadcast %344 : vector<1x96xf32> to vector<16x96xf32>
    %346 = arith.addf %343, %345 : vector<16x96xf32>
    %cst_127 = arith.constant 5.000000e-01 : f32
    %347 = vector.broadcast %cst_127 : f32 to vector<16x96xf32>
    %348 = arith.mulf %347, %346 : vector<16x96xf32>
    %cst_128 = arith.constant 4.471500e-02 : f32
    %349 = vector.broadcast %cst_128 : f32 to vector<16x96xf32>
    %350 = arith.mulf %349, %346 : vector<16x96xf32>
    %351 = arith.mulf %350, %346 : vector<16x96xf32>
    %352 = arith.mulf %351, %346 : vector<16x96xf32>
    %353 = arith.addf %346, %352 : vector<16x96xf32>
    %cst_129 = arith.constant 0.797884583 : f32
    %354 = vector.broadcast %cst_129 : f32 to vector<16x96xf32>
    %355 = arith.mulf %354, %353 : vector<16x96xf32>
    %356 = math.tanh %355 : vector<16x96xf32>
    %cst_130 = arith.constant 1.000000e+00 : f32
    %357 = vector.broadcast %cst_130 : f32 to vector<16x96xf32>
    %358 = arith.addf %357, %356 : vector<16x96xf32>
    %359 = arith.mulf %348, %358 : vector<16x96xf32>
    %c4_131 = arith.constant 4 : index
    %c0_132 = arith.constant 0 : index
    %360 = vector.load %arg5[%c4_131, %c0_132] : memref<22x288xf32, #tpu.memory_space<vmem>>, vector<1x96xf32>
    %361 = vector.broadcast %360 : vector<1x96xf32> to vector<16x96xf32>
    %362 = arith.mulf %359, %361 : vector<16x96xf32>
    %cst_133 = arith.constant dense<0.000000e+00> : vector<16xf32>
    %363 = vector.multi_reduction <add>, %362, %cst_133 [1] : vector<16x96xf32> to vector<16xf32>
    %364 = vector.shape_cast %363 : vector<16xf32> to vector<16x1xf32>
    %c5_134 = arith.constant 5 : index
    %c0_135 = arith.constant 0 : index
    %365 = vector.load %arg5[%c5_134, %c0_135] : memref<22x288xf32, #tpu.memory_space<vmem>>, vector<1x1xf32>
    %366 = vector.broadcast %365 : vector<1x1xf32> to vector<16x1xf32>
    %367 = arith.addf %364, %366 : vector<16x1xf32>
    %368 = vector.broadcast %367 : vector<16x1xf32> to vector<16x96xf32>
    %369 = arith.mulf %368, %24 : vector<16x96xf32>
    %370 = vector.broadcast %6 : vector<16x1xf32> to vector<16x96xf32>
    %371 = arith.addf %369, %370 : vector<16x96xf32>
    %372 = vector.shape_cast %371 : vector<16x96xf32> to vector<2x8x96xf32>
    %c0_136 = arith.constant 0 : index
    %c0_137 = arith.constant 0 : index
    %c0_138 = arith.constant 0 : index
    %373 = vector.load %arg6[%c0_136, %c0_137, %c0_138] : memref<2x8x96xf32, #tpu.memory_space<vmem>>, vector<2x8x96xf32>
    tpu.vector_store %arg6[%c0_136, %c0_137, %c0_138], %372 {strides = array<i32>} : memref<2x8x96xf32, #tpu.memory_space<vmem>>, vector<2x8x96xf32>,
    return
  }
  func.func @transform_0(%arg0: i32) -> (i32, i32, i32) {
    %c0_i32 = arith.constant 0 : i32
    %c0_i32_0 = arith.constant 0 : i32
    %c0_i32_1 = arith.constant 0 : i32
    return %arg0, %c0_i32, %c0_i32_0 : i32, i32, i32
  }
  func.func @transform_1(%arg0: i32) -> (i32, i32) {
    %c0_i32 = arith.constant 0 : i32
    %c0_i32_0 = arith.constant 0 : i32
    %c0_i32_1 = arith.constant 0 : i32
    return %c0_i32, %c0_i32_0 : i32, i32
  }
  func.func @transform_2(%arg0: i32) -> (i32, i32, i32) {
    %c0_i32 = arith.constant 0 : i32
    %c0_i32_0 = arith.constant 0 : i32
    %c0_i32_1 = arith.constant 0 : i32
    %c0_i32_2 = arith.constant 0 : i32
    return %c0_i32, %c0_i32_0, %c0_i32_1 : i32, i32, i32
  }
  func.func @transform_3(%arg0: i32) -> (i32, i32, i32) {
    %c0_i32 = arith.constant 0 : i32
    %c0_i32_0 = arith.constant 0 : i32
    %c0_i32_1 = arith.constant 0 : i32
    %c0_i32_2 = arith.constant 0 : i32
    return %c0_i32, %c0_i32_0, %c0_i32_1 : i32, i32, i32
  }
  func.func @transform_4(%arg0: i32) -> (i32, i32) {
    %c0_i32 = arith.constant 0 : i32
    %c0_i32_0 = arith.constant 0 : i32
    %c0_i32_1 = arith.constant 0 : i32
    return %c0_i32, %c0_i32_0 : i32, i32
  }
  func.func @transform_5(%arg0: i32) -> (i32, i32, i32) {
    %c0_i32 = arith.constant 0 : i32
    %c0_i32_0 = arith.constant 0 : i32
    %c0_i32_1 = arith.constant 0 : i32
    return %arg0, %c0_i32, %c0_i32_0 : i32, i32, i32
  }
}

</mosaic_0001>

<bundles_post_ra>
// kernel: tmixer_forward.1
= control target key start
LH: loop header
LB: loop body
LE: loop exit
PB: predicated region body
PF: predicated region fallthrough
CT: control target
= control target key end

     0   :  { %10 = vsyncpa [#allocation3], 0  ;;  %s2903_s0 = inlined_call_operand.vmem [shape: f32[2,8,96], index: 0, kind: input, shape index: {}]   ;;  %s2904_s1 = inlined_call_operand.vmem [shape: f32[16,16], index: 1, kind: input, shape index: {}]   ;;  %s2905_s2 = inlined_call_operand.hbm [shape: bf16[10,96,96], index: 2, kind: input, shape index: {}]   ;;  %s2906_s3 = inlined_call_operand.hbm [shape: bf16[2,96,288], index: 3, kind: input, shape index: {}]   ;;  %s2907_s4 = inlined_call_operand.vmem [shape: f32[22,288], index: 4, kind: input, shape index: {}]   ;;  %s2908_s5 = inlined_call_operand.hbm [shape: f32[2,8,96], index: 5, kind: output, shape index: {}]  }
   0x1   :  { %11 = vsyncpa [#allocation6], 0 }
   0x2   :  { %12 = vsyncpa [#allocation4], 0  ;;  %s21_s20 = sshll.u32 %s2905_s2, 4  ;;  %s2574_s21 = smov [#allocation2]   ;;  %s22_s20 = int_to_ptr.hbm [resolvable:$true] %s21_s20 }
   0x3   :  { %s23_s22 = sshll.u32 %s2574_s21, 4  ;;  %s34_s25 = sshll.u32 %s2906_s3, 4  ;;  %s24_s22 = int_to_ptr.vmem [resolvable:$true] %s23_s22  ;;  %s35_s25 = int_to_ptr.hbm [resolvable:$true] %s34_s25 }
   0x4   :  { %s2575_s26 = smov 64   ;;  %s2576_s27 = smov 4  }
   0x5   :  { %29 = dma.hbm_to_vmem [thread:$0]  %s22_s20, 7680, %s24_s22, [#allocation3], %s2575_s26, %s2575_s26, %s2576_s27  }
   0x6   :  { %s2577_s28 = smov [#allocation5]   ;;  %s2578_s30 = smov 192  }
   0x7   :  { %s36_s29 = sshll.u32 %s2577_s28, 4  ;;  %s2579_s6 = smov 12   ;;  %s37_s29 = int_to_ptr.vmem [resolvable:$true] %s36_s29 }
   0x8   :  { %42 = dma.hbm_to_vmem [thread:$0]  %s35_s25, 4608, %s37_s29, [#allocation6], %s2578_s30, %s2578_s30, %s2579_s6  }
   0x9   :  { %2568 = dma.done.wait [#allocation3], 7680  }
   0xa   :  { %2569 = vsyncadd [#allocation3], 4294959616 }
   0xb   :  { %2570 = dma.done.wait [#allocation6], 4608  }
   0xc   :  { %2571 = vsyncadd [#allocation6], 4294962688  ;;  %v2292_v0 = vld [vmem:[#allocation2 + $0x28] sm:$0xff]  ;;  %v2291_v1 = vld [vmem:[#allocation2 + $0x20] sm:$0xff]  ;;  %vm126_vm0 = vcmask 785408   ;;  %v74_v44 = vlaneseq  ;;  %vm398_vm2 = vcmask 261120  }
   0xd   :  { %132 = vmatpush.bf16.msra.mxu0 %v2292_v0  ;;  %v2298_v2 = vld [vmem:[#allocation2 + $0x58] sm:$0xff]  ;;  %v2297_v3 = vld [vmem:[#allocation2 + $0x50] sm:$0xff]  ;;  %v2288_v6 = vld [vmem:[#allocation2 + $0x8] sm:$0xff]  ;;  %s2580_s15 = smov 96   ;;  %vm419_vm3 = vcmask 130048   ;;  %vm618_vm4 = vcmask 523264  }
   0xe   :  { %204 = vmatpush.bf16.msra.mxu1 %v2298_v2  ;;  %v2290_v4 = vld [vmem:[#allocation2 + $0x18] sm:$0xff]  ;;  %v2289_v5 = vld [vmem:[#allocation2 + $0x10] sm:$0xff]  ;;  %v2287_v7 = vld [vmem:[#allocation2] sm:$0xff]  ;;  %v75_v46 = vand.u32 127, %v74_v44  ;;  %s2583_s27 = smov 80   ;;  %s1859_s11 = sshll.u32 %s2908_s5, 4  ;;  %s1860_s11 = int_to_ptr.hbm [resolvable:$true] %s1859_s11 }
   0xf   :  { %v54_v8 = vld [vmem:[%s2903_s0] sm:$0xff]  ;;  %v55_v9 = vld [vmem:[%s2903_s0 + $0x8] sm:$0xff]  ;;  %v2294_v13 = vld [vmem:[#allocation2 + $0x38] sm:$0xff]  ;;  %s2587_s12 = smov 8  }
  0x10   :  { %v56_v10 = vpack.c.bf16 %v55_v9, %v54_v8  ;;  %v2296_v11 = vld [vmem:[#allocation2 + $0x48] sm:$0xff]  ;;  %v2295_v12 = vld [vmem:[#allocation2 + $0x40] sm:$0xff]  ;;  %v2293_v14 = vld [vmem:[#allocation2 + $0x30] sm:$0xff]  ;;  %vm76_vm1 = vcmp.lt.s32.totalorder %v75_v46, 32 }
  0x11   :  { %133 = vmatpush.bf16.msra.mxu0 %v2291_v1  ;;  %v1986_v15 = vld [vmem:[#allocation5 + $0x78] sm:$0xf]  ;;  %v2315_v16 = vld [vmem:[#allocation5 + $0x80] sm:$0xf0]  ;;  %v2314_v17 = vld [vmem:[#allocation5 + $0x7c] sm:$0xf] }
  0x12   :  { %205 = vmatpush.bf16.msra.mxu1 %v2297_v3  ;;  %v1987_v18 = vor.u32 %v2315_v16, %v1986_v15  ;;  %v1988_v19 = vld [vmem:[#allocation5 + $0x84] sm:$0xf0]  ;;  %v1994_v20 = vld [vmem:[#allocation5 + $0x80] sm:$0xf]  ;;  %v2316_v21 = vld [vmem:[#allocation5 + $0x88] sm:$0xf0] }
  0x13   :  { %v1991_v22 = vor.u32 %v2314_v17, %v1988_v19  ;;  %v1995_v23 = vor.u32 %v2316_v21, %v1994_v20  ;;  %v1974_v24 = vld [vmem:[#allocation5 + $0x60] sm:$0xf]  ;;  %v2312_v25 = vld [vmem:[#allocation5 + $0x68] sm:$0xf0]  ;;  %v2311_v26 = vld [vmem:[#allocation5 + $0x64] sm:$0xf] }
  0x14   :  { %351 = vmatpush.bf16.msra.mxu2 %v1987_v18  ;;  %v1975_v27 = vor.u32 %v2312_v25, %v1974_v24  ;;  %v1976_v28 = vld [vmem:[#allocation5 + $0x6c] sm:$0xf0]  ;;  %v1982_v29 = vld [vmem:[#allocation5 + $0x68] sm:$0xf]  ;;  %v2313_v30 = vld [vmem:[#allocation5 + $0x70] sm:$0xf0] }
  0x15   :  { %134 = vmatpush.bf16.msra.mxu0 %v2290_v4  ;;  %365 = vmatpush.bf16.msra.mxu3 %v1991_v22  ;;  %v1979_v31 = vor.u32 %v2311_v26, %v1976_v28  ;;  %v1983_v32 = vor.u32 %v2313_v30, %v1982_v29  ;;  %v1962_v33 = vld [vmem:[#allocation5 + $0x48] sm:$0xf]  ;;  %v2309_v34 = vld [vmem:[#allocation5 + $0x50] sm:$0xf0]  ;;  %v2308_v35 = vld [vmem:[#allocation5 + $0x4c] sm:$0xf] }
  0x16   :  { %206 = vmatpush.bf16.msra.mxu1 %v2296_v11  ;;  %v1964_v36 = vld [vmem:[#allocation5 + $0x54] sm:$0xf0]  ;;  %v1970_v37 = vld [vmem:[#allocation5 + $0x50] sm:$0xf]  ;;  %v2310_v38 = vld [vmem:[#allocation5 + $0x58] sm:$0xf0]  ;;  %v1963_v39 = vor.u32 %v2309_v34, %v1962_v33 }
  0x17   :  { %v1967_v40 = vor.u32 %v2308_v35, %v1964_v36  ;;  %v1971_v41 = vor.u32 %v2310_v38, %v1970_v37  ;;  %v89_v43 = vld [vmem:[%s2907_s4] ss:$0 sm:$0xff]  ;;  %v1950_v54 = vld [vmem:[#allocation5 + $0x30] sm:$0xf]  ;;  %v2306_v55 = vld [vmem:[#allocation5 + $0x38] sm:$0xf0] }
  0x18   :  { %352 = vmatpush.bf16.msra.mxu2 %v1975_v27  ;;  %v2305_v56 = vld [vmem:[#allocation5 + $0x34] sm:$0xf]  ;;  %v1951_v57 = vor.u32 %v2306_v55, %v1950_v54  ;;  %v1952_v58 = vld [vmem:[#allocation5 + $0x3c] sm:$0xf0]  ;;  %v1958_v59 = vld [vmem:[#allocation5 + $0x38] sm:$0xf] }
  0x19   :  { %135 = vmatpush.bf16.msra.mxu0 %v2289_v5  ;;  %366 = vmatpush.bf16.msra.mxu3 %v1979_v31  ;;  %v2307_v60 = vld [vmem:[#allocation5 + $0x40] sm:$0xf0]  ;;  %v1955_v61 = vor.u32 %v2305_v56, %v1952_v58  ;;  %v1938_v63 = vld [vmem:[#allocation5 + $0x18] sm:$0xf]  ;;  %v2302_v1 = vld [vmem:[#allocation5 + $0x1c] sm:$0xf] }
  0x1a   :  { %207 = vmatpush.bf16.msra.mxu1 %v2295_v12  ;;  %v1959_v62 = vor.u32 %v2307_v60, %v1958_v59  ;;  %v2303_v0 = vld [vmem:[#allocation5 + $0x20] sm:$0xf0]  ;;  %v1940_v3 = vld [vmem:[#allocation5 + $0x24] sm:$0xf0]  ;;  %v1946_v4 = vld [vmem:[#allocation5 + $0x20] sm:$0xf] }
  0x1b   :  { %v1939_v2 = vor.u32 %v2303_v0, %v1938_v63  ;;  %v2304_v5 = vld [vmem:[#allocation5 + $0x28] sm:$0xf0]  ;;  %v1926_v8 = vld [vmem:[#allocation5] sm:$0xf]  ;;  %v1928_v12 = vld [vmem:[#allocation5 + $0xc] sm:$0xf0] }
  0x1c   :  { %353 = vmatpush.bf16.msra.mxu2 %v1963_v39  ;;  %v2300_v9 = vld [vmem:[#allocation5 + $0x8] sm:$0xf0]  ;;  %v162_v18 = vld [vmem:[%s2907_s4 + $0x1] ss:$0 sm:$0xff] }
  0x1d   :  { %136 = vmatpush.bf16.msra.mxu0 %v2288_v6  ;;  %367 = vmatpush.bf16.msra.mxu3 %v1967_v40  ;;  %v1943_v6 = vor.u32 %v2302_v1, %v1940_v3  ;;  %v1927_v11 = vor.u32 %v2300_v9, %v1926_v8  ;;  %v1923_v26 = vld [vmem:[%s2907_s4 + $0x6] ss:$8 sm:$0x7] }
  0x1e   :  { %208 = vmatpush.bf16.msra.mxu1 %v2294_v13  ;;  %v1934_v13 = vld [vmem:[#allocation5 + $0x8] sm:$0xf]  ;;  %v244_v27 = vperm.slane %v1923_v26, 0  ;;  %v245_v28 = vperm.slane %v1923_v26, 1  ;;  %v246_v29 = vperm.slane %v1923_v26, 2 }
  0x1f   :  { %v2671_v56 = vld [vmem:[%s2904_s1 + $0x8] sm:$0xff] }
  0x20   :  { %354 = vmatpush.bf16.msra.mxu2 %v1951_v57 }
  0x21   :  { %137 = vmatpush.bf16.msra.mxu0 %v2287_v7  ;;  %368 = vmatpush.bf16.msra.mxu3 %v1955_v61  ;;  %v1947_v7 = vor.u32 %v2304_v5, %v1946_v4 }
  0x22   :  { %209 = vmatpush.bf16.msra.mxu1 %v2293_v14  ;;  %v2301_v14 = vld [vmem:[#allocation5 + $0x10] sm:$0xf0] }
  0x23   :  { %v1935_v16 = vor.u32 %v2301_v14, %v1934_v13 }
  0x24   :  { %1897 = vmatmul.msk.bf16.vlgmr.msra.gmra.mxu0 %vm126_vm0, %v56_v10  ;;  %355 = vmatpush.bf16.msra.mxu2 %v1939_v2  ;;  %v2299_v10 = vld [vmem:[#allocation5 + $0x4] sm:$0xf] }
  0x25   :  { %379 = vmatpush.bf16.msrb.mxu0 %v1995_v23  ;;  %369 = vmatpush.bf16.msra.mxu3 %v1943_v6  ;;  %v1931_v15 = vor.u32 %v2299_v10, %v1928_v12 }
  0x28   :  { %356 = vmatpush.bf16.msra.mxu2 %v1927_v11 }
  0x29   :  { %380 = vmatpush.bf16.msrb.mxu0 %v1983_v32  ;;  %370 = vmatpush.bf16.msra.mxu3 %v1931_v15 }
  0x2d   :  { %381 = vmatpush.bf16.msrb.mxu0 %v1971_v41 }
  0x31   :  { %382 = vmatpush.bf16.msrb.mxu0 %v1959_v62 }
  0x35   :  { %383 = vmatpush.bf16.msrb.mxu0 %v1947_v7 }
  0x39   :  { %384 = vmatpush.bf16.msrb.mxu0 %v1935_v16 }
  0xa1   :  { %v139_v42 = vpop.f32.mrf.mxu0 }
  0xa2   :  { %v140_v45 = vadd.f32 %v139_v42, %v89_v43 }
  0xa4   :  { %v144_v48 = vand.u32 2147483647, %v140_v45 }
  0xa6   :  { %v146_v51 = vsel %vm76_vm1, %v144_v48, %v140_v45 }
  0xa9   :  { %v141_v47 = vpop.f32.mrf.mxu0 }
  0xaa   :  { %v142_v49 = vadd.f32 %v141_v47, %v89_v43 }
  0xac   :  { %v145_v50 = vand.u32 2147483647, %v142_v49 }
  0xae   :  { %v147_v52 = vsel %vm76_vm1, %v145_v50, %v142_v49 }
  0xaf   :  { %v148_v53 = vpack.c.bf16 %v147_v52, %v146_v51  ;;  %v2664_v52 = vld [vmem:[%s2904_s1] sm:$0xff]  ;;  %s2581_s1 = smov 32  }
  0xb1   :  { %1922 = vmatmul.msk.bf16.vlgmr.msra.gmra.mxu1 %vm126_vm0, %v148_v53 }
 0x12e   :  { %v211_v17 = vpop.f32.mrf.mxu1 }
 0x12f   :  { %v2640_v20 = vadd.f32 %v211_v17, %v162_v18 }
 0x136   :  { %v213_v19 = vpop.f32.mrf.mxu1 }
 0x137   :  { %v2642_v21 = vadd.f32 %v213_v19, %v162_v18 }
 0x139   :  { %v216_v22 = vpack.c.bf16 %v2642_v21, %v2640_v20 }
 0x13b   :  { %1996 = vmatmul.msk.bf16.vlgmr.msra.gmra.mxu2 %vm126_vm0, %v216_v22  ;;  %1997 = vmatmul.msk.bf16.vlgmr.msra.gmra.mxu3 %vm126_vm0, %v216_v22 }
 0x13c   :  { %1998 = vmatmul.msk.bf16.vlgmr.msrb.gmra.mxu0 %vm126_vm0, %v216_v22 }
 0x1b9   :  { %v386_v23 = vpop.f32.mrf.mxu0 }
 0x1ba   :  { %v387_v38 = vadd.f32 %v386_v23, %v246_v29 }
 0x1be   :  { %v358_v24 = vpop.f32.mrf.mxu2  ;;  %v372_v25 = vpop.f32.mrf.mxu3 }
 0x1bf   :  { %v359_v31 = vadd.f32 %v358_v24, %v244_v27  ;;  %v373_v34 = vadd.f32 %v372_v25, %v245_v28 }
 0x1c1   :  { %v388_v30 = vpop.f32.mrf.mxu0  ;;  %v391_v39 = vmul.f32 0.17677669, %v359_v31  ;;  %v531_v47 = vmul.f32 0.17677669, %v373_v34 }
 0x1c2   :  { %v389_v35 = vadd.f32 %v388_v30, %v246_v29 }
 0x1c4   :  { %v534_v43 = vpack.c.bf16 %v389_v35, %v387_v38 }
 0x1c6   :  { %v360_v32 = vpop.f32.mrf.mxu2  ;;  %v374_v33 = vpop.f32.mrf.mxu3 }
 0x1c7   :  { %v361_v36 = vadd.f32 %v360_v32, %v244_v27  ;;  %v375_v37 = vadd.f32 %v374_v33, %v245_v28 }
 0x1c9   :  { %v392_v40 = vmul.f32 0.17677669, %v361_v36  ;;  %v2652_v41 = vpack.c.bf16 %v375_v37, %v373_v34  ;;  %v394_v42 = vpack.c.bf16 %v361_v36, %v359_v31  ;;  %v532_v46 = vmul.f32 0.17677669, %v375_v37 }
 0x1cb   :  { %v393_v44 = vpack.c.bf16 %v392_v40, %v391_v39  ;;  %443 = vrot.lane.b32.xlu2 %v394_v42, %s2575_s26  ;;  %396 = vrot.lane.b32.xlu0 %v394_v42, %s2580_s15  ;;  %v471_v45 = vsel %vm398_vm2, %v2652_v41, 0  ;;  %v533_v48 = vpack.c.bf16 %v532_v46, %v531_v47 }
 0x1cc   :  { %480 = vmatpush.bf16.xpose.msrb.mxu3 %v471_v45 }
 0x1d3   :  { %536 = vrot.lane.b32.xlu2 %v533_v48, %s2575_s26 }
 0x1d4   :  { %593 = vmatpush.bf16.msra.mxu3 %v534_v43 }
 0x225   :  { %v444_v49 = vpop.permute.xlu2 %443 }
 0x226   :  { %456 = vmatpush.bf16.msrb.mxu2 %v444_v49 }
 0x22d   :  { %v537_v6 = vpop.permute.xlu2 %536 }
 0x23d   :  { %v397_v50 = vpop.permute.xlu0 %396 }
 0x23e   :  { %v403_v51 = vsel %vm398_vm2, %v397_v50, 0 }
 0x23f   :  { %412 = vmatpush.bf16.xpose.msrb.mxu1 %v403_v51 }
 0x246   :  { %1999 = vmatmul.msk.bf16.vlgmr.msrb.gmra.mxu1 %vm398_vm2, %v393_v44 }
 0x2c3   :  { %v414_v53 = vpop.f32.mrf.mxu1 }
 0x2c4   :  { %v415_v54 = vadd.f32 %v414_v53, %v2664_v52 }
 0x2c6   :  { %v420_v55 = vsel %vm419_vm3, %v415_v54, -inf }
 0x2c7   :  { %421 = vmax.xlane.f32.xlu0 %v420_v55 }
 0x2cb   :  { %v416_v57 = vpop.f32.mrf.mxu1 }
 0x2cc   :  { %v417_v58 = vadd.f32 %v416_v57, %v2671_v56 }
 0x2ce   :  { %v423_v59 = vsel %vm419_vm3, %v417_v58, -inf }
 0x2cf   :  { %424 = vmax.xlane.f32.xlu1 %v423_v59 }
 0x33a   :  { %v422_v60 = vpop.xlane.xlu0 %421 }
 0x33b   :  { %v426_v61 = vsub.f32 %v415_v54, %v422_v60 }
 0x33d   :  { %v428_v62 = vmul.f32 1.442695, %v426_v61 }
 0x33f   :  { %2420 = vpow2.f32 %v428_v62 }
 0x342   :  { %v425_v63 = vpop.xlane.xlu1 %424 }
 0x343   :  { %v427_v0 = vsub.f32 %v417_v58, %v425_v63 }
 0x345   :  { %v2421_v1 = vpop.eup %2420  ;;  %v430_v2 = vmul.f32 1.442695, %v427_v0 }
 0x346   :  { %v432_v3 = vsel %vm419_vm3, %v2421_v1, 0.0 }
 0x347   :  { %2422 = vpow2.f32 %v430_v2  ;;  %433 = vadd.xlane.f32.xlu1 %v432_v3 }
 0x34d   :  { %v2423_v4 = vpop.eup %2422 }
 0x34e   :  { %v435_v5 = vsel %vm419_vm3, %v2423_v4, 0.0 }
 0x34f   :  { %436 = vadd.xlane.f32.xlu2 %v435_v5 }
 0x360   :  { %538 = vrot.lane.b32.xlu1 %v2652_v41, %s2581_s1 }
 0x367   :  { %465 = vrot.lane.b32.xlu2 %v393_v44, %s2581_s1 }
 0x3ba   :  { %v434_v7 = vpop.xlane.xlu1 %433 }
 0x3bb   :  { %2424 = vrcp.f32 %v434_v7  ;;  %v2321_v7 = vld [vmem:[#allocation2 + $0xe0] sm:$0xff] }
 0x3c1   :  { %v2425_v9 = vpop.eup %2424 }
 0x3c2   :  { %v437_v8 = vpop.xlane.xlu2 %436  ;;  %v440_v11 = vmul.f32 %v2425_v9, %v2421_v1  ;;  %v2319_v9 = vld [vmem:[#allocation2 + $0xd0] sm:$0xff] }
 0x3c3   :  { %2426 = vrcp.f32 %v437_v8  ;;  %v2320_v8 = vld [vmem:[#allocation2 + $0xd8] sm:$0xff] }
 0x3c9   :  { %v2427_v10 = vpop.eup %2426 }
 0x3ca   :  { %v441_v12 = vmul.f32 %v2427_v10, %v2423_v4  ;;  %v466_v13 = vpop.permute.xlu2 %465 }
 0x3cb   :  { %2001 = vmatmul.msk.bf16.vlgmr.msrb.gmra.mxu3 %vm398_vm2, %v466_v13 }
 0x3cc   :  { %v442_v14 = vpack.c.bf16 %v441_v12, %v440_v11 }
 0x3ce   :  { %2000 = vmatmul.msk.bf16.vlgmr.msrb.gmra.mxu2 %vm419_vm3, %v442_v14 }
 0x3d2   :  { %v539_v15 = vpop.permute.xlu1 %538 }
 0x3d3   :  { %v544_v16 = vsel %vm398_vm2, %v539_v15, 0 }
 0x3d4   :  { %553 = vmatpush.bf16.xpose.msra.mxu2 %v544_v16  ;;  %v2318_v16 = vld [vmem:[#allocation2 + $0xc8] sm:$0xff] }
 0x3de   :  { %2003 = vmatmul.msk.bf16.vlgmr.msra.gmra.mxu2 %vm398_vm2, %v537_v6  ;;  %v2322_v6 = vld [vmem:[#allocation2 + $0xe8] sm:$0xff] }
 0x3df   :  { %677 = vmatpush.bf16.msra.mxu0 %v2322_v6 }
 0x3e3   :  { %678 = vmatpush.bf16.msra.mxu0 %v2321_v7  ;;  %v2333_v7 = vld [vmem:[#allocation2 + $0x140] sm:$0xff] }
 0x3e7   :  { %679 = vmatpush.bf16.msra.mxu0 %v2320_v8 }
 0x3eb   :  { %680 = vmatpush.bf16.msra.mxu0 %v2319_v9 }
 0x3ef   :  { %681 = vmatpush.bf16.msra.mxu0 %v2318_v16 }
 0x44e   :  { %v482_v17 = vpop.f32.mrf.mxu3 }
 0x44f   :  { %v483_v18 = vadd.f32 %v482_v17, %v2664_v52  ;;  %v2317_v17 = vld [vmem:[#allocation2 + $0xc0] sm:$0xff] }
 0x450   :  { %682 = vmatpush.bf16.msra.mxu0 %v2317_v17 }
 0x451   :  { %v2685_v19 = vpop.f32.mrf.mxu2  ;;  %v487_v22 = vsel %vm419_vm3, %v483_v18, -inf }
 0x452   :  { %488 = vmax.xlane.f32.xlu0 %v487_v22 }
 0x456   :  { %v484_v23 = vpop.f32.mrf.mxu3 }
 0x457   :  { %v485_v24 = vadd.f32 %v484_v23, %v2671_v56 }
 0x459   :  { %v2689_v25 = vpop.f32.mrf.mxu2  ;;  %v490_v26 = vsel %vm419_vm3, %v485_v24, -inf }
 0x45a   :  { %491 = vmax.xlane.f32.xlu0 %v490_v26 }
 0x461   :  { %v555_v27 = vpop.f32.mrf.mxu2 }
 0x462   :  { %v556_v28 = vadd.f32 %v555_v27, %v2664_v52 }
 0x464   :  { %v560_v29 = vsel %vm419_vm3, %v556_v28, -inf }
 0x465   :  { %561 = vmax.xlane.f32.xlu1 %v560_v29 }
 0x469   :  { %v557_v30 = vpop.f32.mrf.mxu2 }
 0x46a   :  { %v558_v31 = vadd.f32 %v557_v30, %v2671_v56 }
 0x46c   :  { %v563_v32 = vsel %vm419_vm3, %v558_v31, -inf }
 0x46d   :  { %564 = vmax.xlane.f32.xlu2 %v563_v32 }
 0x485   :  { %511 = vrot.lane.b32.xlu2 %v2652_v41, %s2580_s15 }
 0x4c5   :  { %v489_v33 = vpop.xlane.xlu0 %488 }
 0x4c6   :  { %v493_v46 = vsub.f32 %v483_v18, %v489_v33  ;;  %v635_v33 = vld [vmem:[%s2907_s4 + $0x7] ss:$0 sm:$0xff] }
 0x4c8   :  { %v495_v48 = vmul.f32 1.442695, %v493_v46 }
 0x4cd   :  { %v492_v34 = vpop.xlane.xlu0 %491 }
 0x4ce   :  { %v494_v35 = vsub.f32 %v485_v24, %v492_v34 }
 0x4d0   :  { %v497_v36 = vmul.f32 1.442695, %v494_v35 }
 0x4d2   :  { %2428 = vpow2.f32 %v497_v36 }
 0x4d8   :  { %v2429_v37 = vpop.eup %2428  ;;  %v562_v38 = vpop.xlane.xlu1 %561 }
 0x4d9   :  { %v566_v39 = vsub.f32 %v556_v28, %v562_v38  ;;  %v502_v40 = vsel %vm419_vm3, %v2429_v37, 0.0 }
 0x4da   :  { %503 = vadd.xlane.f32.xlu1 %v502_v40  ;;  %v2582_v40 = vmov 96.0  }
 0x4db   :  { %v568_v42 = vmul.f32 1.442695, %v566_v39 }
 0x4dd   :  { %2430 = vpow2.f32 %v568_v42 }
 0x4e0   :  { %v565_v43 = vpop.xlane.xlu2 %564 }
 0x4e1   :  { %v567_v44 = vsub.f32 %v558_v31, %v565_v43 }
 0x4e3   :  { %v2431_v45 = vpop.eup %2430  ;;  %v570_v47 = vmul.f32 1.442695, %v567_v44 }
 0x4e4   :  { %v572_v41 = vsel %vm419_vm3, %v2431_v45, 0.0 }
 0x4e5   :  { %2432 = vpow2.f32 %v570_v47  ;;  %573 = vadd.xlane.f32.xlu0 %v572_v41 }
 0x4e6   :  { %2434 = vpow2.f32 %v495_v48 }
 0x4e8   :  { %v512_v49 = vpop.permute.xlu2 %511 }
 0x4e9   :  { %524 = vmatpush.bf16.msra.mxu1 %v512_v49 }
 0x4eb   :  { %v2433_v50 = vpop.eup %2432 }
 0x4ec   :  { %v575_v51 = vsel %vm419_vm3, %v2433_v50, 0.0  ;;  %v2435_v53 = vpop.eup %2434 }
 0x4ed   :  { %576 = vadd.xlane.f32.xlu0 %v575_v51  ;;  %v499_v54 = vsel %vm419_vm3, %v2435_v53, 0.0 }
 0x4f5   :  { %500 = vadd.xlane.f32.xlu0 %v499_v54 }
 0x54d   :  { %v504_v58 = vpop.xlane.xlu1 %503 }
 0x558   :  { %v574_v55 = vpop.xlane.xlu0 %573 }
 0x559   :  { %2436 = vrcp.f32 %v574_v55 }
 0x55f   :  { %v2437_v59 = vpop.eup %2436 }
 0x560   :  { %v577_v57 = vpop.xlane.xlu0 %576  ;;  %v580_v61 = vmul.f32 %v2437_v59, %v2431_v45  ;;  %v2328_v59 = vld [vmem:[#allocation2 + $0x118] sm:$0xff] }
 0x561   :  { %2438 = vrcp.f32 %v577_v57  ;;  %804 = vmatpush.bf16.msrb.mxu1 %v2328_v59 }
 0x562   :  { %2440 = vrcp.f32 %v504_v58 }
 0x567   :  { %v2439_v60 = vpop.eup %2438 }
 0x568   :  { %v581_v62 = vmul.f32 %v2439_v60, %v2433_v50  ;;  %v501_v63 = vpop.xlane.xlu0 %500  ;;  %v2441_v1 = vpop.eup %2440  ;;  %v2327_v60 = vld [vmem:[#allocation2 + $0x110] sm:$0xff] }
 0x569   :  { %2442 = vrcp.f32 %v501_v63  ;;  %v508_v3 = vmul.f32 %v2441_v1, %v2429_v37  ;;  %805 = vmatpush.bf16.msrb.mxu1 %v2327_v60  ;;  %v2324_v63 = vld [vmem:[#allocation2 + $0xf8] sm:$0xff] }
 0x56a   :  { %v582_v0 = vpack.c.bf16 %v581_v62, %v580_v61  ;;  %2444 = vrcp.f32 %v2582_v40  ;;  %v2326_v61 = vld [vmem:[#allocation2 + $0x108] sm:$0xff]  ;;  %v2325_v62 = vld [vmem:[#allocation2 + $0x100] sm:$0xff] }
 0x56c   :  { %2004 = vmatmul.msk.bf16.vlgmr.msra.gmra.mxu3 %vm419_vm3, %v582_v0 }
 0x56d   :  { %806 = vmatpush.bf16.msrb.mxu1 %v2326_v61 }
 0x56f   :  { %v2443_v2 = vpop.eup %2442 }
 0x570   :  { %v507_v4 = vmul.f32 %v2443_v2, %v2435_v53  ;;  %v2445_v42 = vpop.eup %2444 }
 0x571   :  { %v700_v43 = vmul.f32 96.0, %v2445_v42  ;;  %vm704_vm5 = vweird.f32 %v2445_v42  ;;  %807 = vmatpush.bf16.msrb.mxu1 %v2325_v62 }
 0x572   :  { %v509_v5 = vpack.c.bf16 %v508_v3, %v507_v4  ;;  %v2323_v3 = vld [vmem:[#allocation2 + $0xf0] sm:$0xff]  ;;  %v2334_v4 = vld [vmem:[#allocation2 + $0x148] sm:$0xff] }
 0x573   :  { %v701_v44 = vsub.f32 1.0, %v700_v43  ;;  %874 = vmatpush.bf16.msrb.mxu2 %v2334_v4  ;;  %v2143_v4 = vld [vmem:[#allocation5 + $0x108] sm:$0xf] }
 0x574   :  { %2002 = vmatmul.msk.bf16.vlgmr.msra.gmra.mxu1 %vm419_vm3, %v509_v5 }
 0x575   :  { %v702_v45 = vmul.f32 %v2445_v42, %v701_v44  ;;  %808 = vmatpush.bf16.msrb.mxu1 %v2324_v63 }
 0x577   :  { %v703_v46 = vadd.f32 %v2445_v42, %v702_v45  ;;  %875 = vmatpush.bf16.msrb.mxu2 %v2333_v7 }
 0x579   :  { %v2720_v47 = vsel %vm704_vm5, %v2445_v42, %v703_v46  ;;  %809 = vmatpush.bf16.msrb.mxu1 %v2323_v3 }
 0x5ef   :  { %v595_v10 = vpop.f32.mrf.mxu3 }
 0x5f1   :  { %v526_v11 = vpop.f32.mrf.mxu1 }
 0x5f7   :  { %v597_v12 = vpop.f32.mrf.mxu3 }
 0x5f8   :  { %v2402_v13 = vpack.i.bf16 %v597_v12, %v595_v10 }
 0x5f9   :  { %v528_v14 = vpop.f32.mrf.mxu1 }
 0x5fa   :  { %v2397_v15 = vpack.i.bf16 %v528_v14, %v526_v11  ;;  %2403 = vrot.lane.b32.xlu1 %v2402_v13, %s2575_s26 }
 0x5fc   :  { %2398 = vrot.lane.b32.xlu0 %v2397_v15, %s2581_s1 }
 0x66c   :  { %v2404_v18 = vpop.permute.xlu1 %2403 }
 0x66d   :  { %v2406_v26 = vunpack.i.h.bf16 %v2404_v18  ;;  %v2405_v27 = vunpack.i.l.bf16 %v2404_v18 }
 0x66e   :  { %v2399_v22 = vpop.permute.xlu0 %2398 }
 0x66f   :  { %v2401_v23 = vunpack.i.h.bf16 %v2399_v22  ;;  %v2400_v24 = vunpack.i.l.bf16 %v2399_v22 }
 0x671   :  { %v617_v28 = vsel %vm398_vm2, %v2689_v25, %v2401_v23  ;;  %v616_v29 = vsel %vm398_vm2, %v2685_v19, %v2400_v24 }
 0x672   :  { %v620_v30 = vsel %vm618_vm4, %v617_v28, %v2406_v26  ;;  %v619_v31 = vsel %vm618_vm4, %v616_v29, %v2405_v27  ;;  %v691_v26 = vld [vmem:[%s2907_s4 + $0x18] ss:$0 sm:$0xff] }
 0x673   :  { %v621_v32 = vpack.c.bf16 %v620_v30, %v619_v31  ;;  %v692_v31 = vld [vmem:[%s2907_s4 + $0x19] ss:$0 sm:$0xff] }
 0x675   :  { %2029 = vmatmul.msk.bf16.vlgmr.msra.gmra.mxu0 %vm126_vm0, %v621_v32 }
 0x6f2   :  { %v684_v34 = vpop.f32.mrf.mxu0 }
 0x6f3   :  { %v685_v35 = vadd.f32 %v684_v34, %v635_v33 }
 0x6f5   :  { %v689_v36 = vadd.f32 %v685_v35, %v2640_v20 }
 0x6f7   :  { %v693_v25 = vsel %vm126_vm0, %v689_v36, 0.0 }
 0x6f8   :  { %694 = vadd.xlane.f32.xlu0 %v693_v25  ;;  %v2331_v25 = vld [vmem:[#allocation2 + $0x130] sm:$0xff] }
 0x6fa   :  { %v686_v37 = vpop.f32.mrf.mxu0 }
 0x6fb   :  { %v687_v19 = vadd.f32 %v686_v37, %v635_v33  ;;  %v2330_v37 = vld [vmem:[#allocation2 + $0x128] sm:$0xff] }
 0x6fd   :  { %v690_v38 = vadd.f32 %v687_v19, %v2642_v21  ;;  %v2329_v19 = vld [vmem:[#allocation2 + $0x120] sm:$0xff] }
 0x6ff   :  { %v696_v39 = vsel %vm126_vm0, %v690_v38, 0.0 }
 0x700   :  { %697 = vadd.xlane.f32.xlu2 %v696_v39  ;;  %v762_v39 = vld [vmem:[%s2907_s4 + $0x1a] ss:$0 sm:$0xff] }
 0x76b   :  { %v695_v41 = vpop.xlane.xlu0 %694 }
 0x76c   :  { %v706_v48 = vmul.f32 %v2720_v47, %v695_v41  ;;  %v832_v41 = vld [vmem:[%s2907_s4 + $0x1b] ss:$0 sm:$0xff] }
 0x76e   :  { %v708_v49 = vsub.f32 %v689_v36, %v706_v48  ;;  %v2332_v36 = vld [vmem:[#allocation2 + $0x138] sm:$0xff] }
 0x76f   :  { %876 = vmatpush.bf16.msrb.mxu2 %v2332_v36  ;;  %v2342_v36 = vld [vmem:[#allocation5 + $0xc8] sm:$0xf0] }
 0x770   :  { %v710_v50 = vmul.f32 %v708_v49, %v708_v49 }
 0x772   :  { %v712_v51 = vsel %vm126_vm0, %v710_v50, 0.0 }
 0x773   :  { %v698_v53 = vpop.xlane.xlu2 %697  ;;  %713 = vadd.xlane.f32.xlu1 %v712_v51  ;;  %877 = vmatpush.bf16.msrb.mxu2 %v2331_v25  ;;  %v2341_v25 = vld [vmem:[#allocation5 + $0xc4] sm:$0xf] }
 0x774   :  { %v707_v54 = vmul.f32 %v2720_v47, %v698_v53 }
 0x776   :  { %v709_v55 = vsub.f32 %v690_v38, %v707_v54 }
 0x777   :  { %878 = vmatpush.bf16.msrb.mxu2 %v2330_v37 }
 0x778   :  { %v711_v57 = vmul.f32 %v709_v55, %v709_v55 }
 0x77a   :  { %v715_v58 = vsel %vm126_vm0, %v711_v57, 0.0 }
 0x77b   :  { %716 = vadd.xlane.f32.xlu0 %v715_v58  ;;  %879 = vmatpush.bf16.msrb.mxu2 %v2329_v19  ;;  %v2109_v19 = vld [vmem:[#allocation5 + $0xcc] sm:$0xf0] }
 0x7e6   :  { %v714_v0 = vpop.xlane.xlu1 %713 }
 0x7e7   :  { %v718_v1 = vmul.f32 %v714_v0, %v2720_v47 }
 0x7e9   :  { %v720_v2 = vadd.f32 1e-05, %v718_v1 }
 0x7eb   :  { %2446 = vrsqrt.f32 %v720_v2  ;;  %vm728_vm7 = vweird.f32 %v720_v2 }
 0x7ee   :  { %v717_v5 = vpop.xlane.xlu0 %716 }
 0x7ef   :  { %v719_v6 = vmul.f32 %v717_v5, %v2720_v47  ;;  %v2351_v5 = vld [vmem:[#allocation5 + $0x110] sm:$0xf0] }
 0x7f0   :  { %v2144_v7 = vor.u32 %v2351_v5, %v2143_v4 }
 0x7f1   :  { %v2447_v8 = vpop.eup %2446  ;;  %v721_v9 = vadd.f32 1e-05, %v719_v6  ;;  %v2350_v6 = vld [vmem:[#allocation5 + $0x10c] sm:$0xf] }
 0x7f2   :  { %v723_v10 = vmul.f32 %v2447_v8, %v720_v2  ;;  %vm729_vm6 = vweird.f32 %v2447_v8  ;;  %1074 = vmatpush.bf16.msrb.mxu3 %v2144_v7 }
 0x7f3   :  { %2448 = vrsqrt.f32 %v721_v9  ;;  %vm730_vm8 = vmor %vm728_vm7, %vm729_vm6  ;;  %vm738_vm10 = vweird.f32 %v721_v9 }
 0x7f4   :  { %v724_v11 = vmul.f32 %v2447_v8, %v723_v10  ;;  %v2352_v10 = vld [vmem:[#allocation5 + $0x118] sm:$0xf0] }
 0x7f6   :  { %v725_v12 = vmul.f32 0.5, %v724_v11 }
 0x7f8   :  { %v726_v13 = vsub.f32 1.5, %v725_v12 }
 0x7f9   :  { %v2449_v14 = vpop.eup %2448 }
 0x7fa   :  { %v727_v15 = vmul.f32 %v2447_v8, %v726_v13  ;;  %v733_v16 = vmul.f32 %v2449_v14, %v721_v9  ;;  %vm739_vm9 = vweird.f32 %v2449_v14  ;;  %v2151_v9 = vld [vmem:[#allocation5 + $0x110] sm:$0xf] }
 0x7fb   :  { %vm740_vm11 = vmor %vm738_vm10, %vm739_vm9  ;;  %v2152_v12 = vor.u32 %v2352_v10, %v2151_v9  ;;  %v2131_v13 = vld [vmem:[#allocation5 + $0xf0] sm:$0xf] }
 0x7fc   :  { %v734_v17 = vmul.f32 %v2449_v14, %v733_v16  ;;  %v731_v18 = vsel %vm730_vm8, %v2447_v8, %v727_v15  ;;  %v2145_v8 = vld [vmem:[#allocation5 + $0x114] sm:$0xf0]  ;;  %v2347_v15 = vld [vmem:[#allocation5 + $0xf4] sm:$0xf] }
 0x7fd   :  { %v742_v24 = vmul.f32 %v731_v18, %v708_v49  ;;  %v2148_v11 = vor.u32 %v2350_v6, %v2145_v8  ;;  %1102 = vmatpush.bf16.msra.mxu1 %v2152_v12  ;;  %v2139_v18 = vld [vmem:[#allocation5 + $0xf8] sm:$0xf] }
 0x7fe   :  { %v735_v22 = vmul.f32 0.5, %v734_v17  ;;  %v2133_v17 = vld [vmem:[#allocation5 + $0xfc] sm:$0xf0] }
 0x7ff   :  { %v744_v29 = vmul.f32 %v742_v24, %v691_v26  ;;  %1088 = vmatpush.bf16.msrb.mxu0 %v2148_v11 }
 0x800   :  { %v736_v23 = vsub.f32 1.5, %v735_v22  ;;  %v2349_v22 = vld [vmem:[#allocation5 + $0x100] sm:$0xf0] }
 0x801   :  { %v746_v33 = vadd.f32 %v744_v29, %v692_v31  ;;  %v2140_v24 = vor.u32 %v2349_v22, %v2139_v18 }
 0x802   :  { %v737_v27 = vmul.f32 %v2449_v14, %v736_v23  ;;  %v2136_v23 = vor.u32 %v2347_v15, %v2133_v17 }
 0x803   :  { %1103 = vmatpush.bf16.msra.mxu1 %v2140_v24 }
 0x804   :  { %v741_v28 = vsel %vm740_vm11, %v2449_v14, %v737_v27  ;;  %v2348_v14 = vld [vmem:[#allocation5 + $0xf8] sm:$0xf0]  ;;  %1089 = vmatpush.bf16.msrb.mxu0 %v2136_v23  ;;  %v2345_v27 = vld [vmem:[#allocation5 + $0xe0] sm:$0xf0] }
 0x805   :  { %v743_v30 = vmul.f32 %v741_v28, %v709_v55  ;;  %v2132_v16 = vor.u32 %v2348_v14, %v2131_v13  ;;  %v2344_v28 = vld [vmem:[#allocation5 + $0xdc] sm:$0xf] }
 0x806   :  { %v888_v23 = vld [vmem:[%s2907_s4 + $0x1c] ss:$0 sm:$0xff] }
 0x807   :  { %v745_v32 = vmul.f32 %v743_v30, %v691_v26  ;;  %1075 = vmatpush.bf16.msrb.mxu3 %v2132_v16  ;;  %v2119_v26 = vld [vmem:[#allocation5 + $0xd8] sm:$0xf]  ;;  %v2121_v30 = vld [vmem:[#allocation5 + $0xe4] sm:$0xf0] }
 0x808   :  { %v2120_v29 = vor.u32 %v2345_v27, %v2119_v26 }
 0x809   :  { %v747_v34 = vadd.f32 %v745_v32, %v692_v31  ;;  %v2127_v31 = vld [vmem:[#allocation5 + $0xe0] sm:$0xf]  ;;  %v2346_v32 = vld [vmem:[#allocation5 + $0xe8] sm:$0xf0] }
 0x80b   :  { %v748_v35 = vpack.c.bf16 %v747_v34, %v746_v33  ;;  %1076 = vmatpush.bf16.msrb.mxu3 %v2120_v29  ;;  %v889_v29 = vld [vmem:[%s2907_s4 + $0x1d] ss:$0 sm:$0xff] }
 0x80d   :  { %2054 = vmatmul.msk.bf16.vlgmr.msrb.gmra.mxu1 %vm126_vm0, %v748_v35  ;;  %v2107_v35 = vld [vmem:[#allocation5 + $0xc0] sm:$0xf] }
 0x80e   :  { %v2108_v37 = vor.u32 %v2342_v36, %v2107_v35 }
 0x810   :  { %1077 = vmatpush.bf16.msrb.mxu3 %v2108_v37 }
 0x88a   :  { %v811_v38 = vpop.f32.mrf.mxu1 }
 0x88b   :  { %v812_v40 = vadd.f32 %v811_v38, %v762_v39  ;;  %v2115_v38 = vld [vmem:[#allocation5 + $0xc8] sm:$0xf] }
 0x88d   :  { %v816_v44 = vmax.f32 %v812_v40, 0.0  ;;  %v2112_v40 = vor.u32 %v2341_v25, %v2109_v19 }
 0x892   :  { %v813_v42 = vpop.f32.mrf.mxu1 }
 0x893   :  { %v814_v43 = vadd.f32 %v813_v42, %v762_v39  ;;  %v2343_v39 = vld [vmem:[#allocation5 + $0xd0] sm:$0xf0] }
 0x894   :  { %v2116_v42 = vor.u32 %v2343_v39, %v2115_v38 }
 0x895   :  { %v817_v45 = vmax.f32 %v814_v43, 0.0  ;;  %v2095_v43 = vld [vmem:[#allocation5 + $0xa8] sm:$0xf] }
 0x897   :  { %v818_v46 = vpack.c.bf16 %v817_v45, %v816_v44  ;;  %v2339_v44 = vld [vmem:[#allocation5 + $0xb0] sm:$0xf0]  ;;  %v2338_v45 = vld [vmem:[#allocation5 + $0xac] sm:$0xf] }
 0x899   :  { %2079 = vmatmul.msk.bf16.vlgmr.msrb.gmra.mxu2 %vm126_vm0, %v818_v46  ;;  %v2096_v46 = vor.u32 %v2339_v44, %v2095_v43 }
 0x89b   :  { %1078 = vmatpush.bf16.msrb.mxu3 %v2096_v46 }
 0x91c   :  { %v881_v48 = vpop.f32.mrf.mxu2 }
 0x91d   :  { %v882_v49 = vadd.f32 %v881_v48, %v832_v41  ;;  %v2103_v48 = vld [vmem:[#allocation5 + $0xb0] sm:$0xf] }
 0x91f   :  { %v886_v50 = vadd.f32 %v882_v49, %v746_v33  ;;  %v2124_v33 = vor.u32 %v2344_v28, %v2121_v30  ;;  %v2340_v49 = vld [vmem:[#allocation5 + $0xb8] sm:$0xf0] }
 0x921   :  { %v890_v51 = vsel %vm126_vm0, %v886_v50, 0.0  ;;  %1090 = vmatpush.bf16.msrb.mxu0 %v2124_v33 }
 0x922   :  { %891 = vadd.xlane.f32.xlu2 %v890_v51 }
 0x924   :  { %v883_v53 = vpop.f32.mrf.mxu2 }
 0x925   :  { %v884_v54 = vadd.f32 %v883_v53, %v832_v41  ;;  %1091 = vmatpush.bf16.msrb.mxu0 %v2112_v40  ;;  %v2097_v41 = vld [vmem:[#allocation5 + $0xb4] sm:$0xf0]  ;;  %v2104_v53 = vor.u32 %v2340_v49, %v2103_v48 }
 0x926   :  { %v2100_v51 = vor.u32 %v2338_v45, %v2097_v41 }
 0x927   :  { %v887_v55 = vadd.f32 %v884_v54, %v747_v34  ;;  %v2128_v34 = vor.u32 %v2346_v32, %v2127_v31 }
 0x929   :  { %v893_v57 = vsel %vm126_vm0, %v887_v55, 0.0  ;;  %1104 = vmatpush.bf16.msra.mxu1 %v2128_v34  ;;  %1092 = vmatpush.bf16.msrb.mxu0 %v2100_v51  ;;  %v2080_v34 = vld [vmem:[%s2907_s4 + $0x1e] ss:$8 sm:$0x7] }
 0x92a   :  { %894 = vadd.xlane.f32.xlu1 %v893_v57  ;;  %v2336_v57 = vld [vmem:[#allocation5 + $0x98] sm:$0xf0]  ;;  %v968_v35 = vperm.slane %v2080_v34, 1  ;;  %v969_v36 = vperm.slane %v2080_v34, 2  ;;  %v967_v43 = vperm.slane %v2080_v34, 0 }
 0x92d   :  { %1105 = vmatpush.bf16.msra.mxu1 %v2116_v42 }
 0x931   :  { %1106 = vmatpush.bf16.msra.mxu1 %v2104_v53 }
 0x995   :  { %v892_v58 = vpop.xlane.xlu2 %891 }
 0x996   :  { %v896_v59 = vmul.f32 %v892_v58, %v2720_v47  ;;  %v2335_v58 = vld [vmem:[#allocation5 + $0x94] sm:$0xf] }
 0x998   :  { %v2745_v60 = vsub.f32 %v886_v50, %v896_v59 }
 0x99a   :  { %v900_v61 = vmul.f32 %v2745_v60, %v2745_v60 }
 0x99c   :  { %v902_v62 = vsel %vm126_vm0, %v900_v61, 0.0 }
 0x99d   :  { %v895_v63 = vpop.xlane.xlu1 %894  ;;  %903 = vadd.xlane.f32.xlu0 %v902_v62  ;;  %v2085_v62 = vld [vmem:[#allocation5 + $0x9c] sm:$0xf0] }
 0x99e   :  { %v897_v0 = vmul.f32 %v895_v63, %v2720_v47  ;;  %v2091_v63 = vld [vmem:[#allocation5 + $0x98] sm:$0xf] }
 0x9a0   :  { %v2751_v1 = vsub.f32 %v887_v55, %v897_v0  ;;  %v2083_v55 = vld [vmem:[#allocation5 + $0x90] sm:$0xf]  ;;  %v2088_v0 = vor.u32 %v2335_v58, %v2085_v62 }
 0x9a1   :  { %v2084_v61 = vor.u32 %v2336_v57, %v2083_v55 }
 0x9a2   :  { %v901_v2 = vmul.f32 %v2751_v1, %v2751_v1  ;;  %1093 = vmatpush.bf16.msrb.mxu0 %v2088_v0 }
 0x9a3   :  { %1079 = vmatpush.bf16.msrb.mxu3 %v2084_v61 }
 0x9a4   :  { %v905_v3 = vsel %vm126_vm0, %v901_v2, 0.0  ;;  %v2337_v2 = vld [vmem:[#allocation5 + $0xa0] sm:$0xf0] }
 0x9a5   :  { %906 = vadd.xlane.f32.xlu2 %v905_v3  ;;  %v2092_v3 = vor.u32 %v2337_v2, %v2091_v63 }
 0x9a7   :  { %1107 = vmatpush.bf16.msra.mxu1 %v2092_v3 }
 0xa10   :  { %v904_v50 = vpop.xlane.xlu0 %903 }
 0xa11   :  { %v908_v54 = vmul.f32 %v904_v50, %v2720_v47 }
 0xa13   :  { %v910_v59 = vadd.f32 1e-05, %v908_v54 }
 0xa15   :  { %2450 = vrsqrt.f32 %v910_v59  ;;  %vm918_vm13 = vweird.f32 %v910_v59 }
 0xa18   :  { %v907_v4 = vpop.xlane.xlu2 %906 }
 0xa19   :  { %v909_v5 = vmul.f32 %v907_v4, %v2720_v47 }
 0xa1b   :  { %v2451_v6 = vpop.eup %2450  ;;  %v911_v7 = vadd.f32 1e-05, %v909_v5 }
 0xa1c   :  { %v913_v8 = vmul.f32 %v2451_v6, %v910_v59  ;;  %vm919_vm12 = vweird.f32 %v2451_v6 }
 0xa1d   :  { %2452 = vrsqrt.f32 %v911_v7  ;;  %vm920_vm14 = vmor %vm918_vm13, %vm919_vm12  ;;  %vm928_vm1 = vweird.f32 %v911_v7 }
 0xa1e   :  { %v914_v9 = vmul.f32 %v2451_v6, %v913_v8 }
 0xa20   :  { %v915_v10 = vmul.f32 0.5, %v914_v9 }
 0xa22   :  { %v916_v11 = vsub.f32 1.5, %v915_v10 }
 0xa23   :  { %v2453_v12 = vpop.eup %2452 }
 0xa24   :  { %v917_v13 = vmul.f32 %v2451_v6, %v916_v11  ;;  %v923_v14 = vmul.f32 %v2453_v12, %v911_v7  ;;  %vm929_vm15 = vweird.f32 %v2453_v12 }
 0xa25   :  { %vm930_vm5 = vmor %vm928_vm1, %vm929_vm15  ;;  %vm67_vm15 = vcmask 31744  }
 0xa26   :  { %v924_v15 = vmul.f32 %v2453_v12, %v923_v14  ;;  %v921_v16 = vsel %vm920_vm14, %v2451_v6, %v917_v13 }
 0xa27   :  { %v932_v22 = vmul.f32 %v921_v16, %v2745_v60 }
 0xa28   :  { %v925_v17 = vmul.f32 0.5, %v924_v15 }
 0xa29   :  { %v934_v27 = vmul.f32 %v932_v22, %v888_v23 }
 0xa2a   :  { %v926_v18 = vsub.f32 1.5, %v925_v17 }
 0xa2b   :  { %v2766_v31 = vadd.f32 %v934_v27, %v889_v29 }
 0xa2c   :  { %v927_v24 = vmul.f32 %v2453_v12, %v926_v18 }
 0xa2e   :  { %v931_v26 = vsel %vm930_vm5, %v2453_v12, %v927_v24 }
 0xa2f   :  { %v933_v28 = vmul.f32 %v931_v26, %v2751_v1 }
 0xa31   :  { %v935_v30 = vmul.f32 %v933_v28, %v888_v23 }
 0xa33   :  { %v2768_v32 = vadd.f32 %v935_v30, %v889_v29 }
 0xa35   :  { %v938_v60 = vpack.c.bf16 %v2768_v32, %v2766_v31 }
 0xa37   :  { %2153 = vmatmul.msk.bf16.vlgmr.msrb.gmra.mxu3 %vm126_vm0, %v938_v60  ;;  %2154 = vmatmul.msk.bf16.vlgmr.msrb.gmra.mxu0 %vm126_vm0, %v938_v60 }
 0xa38   :  { %2155 = vmatmul.msk.bf16.vlgmr.msra.gmra.mxu1 %vm126_vm0, %v938_v60 }
 0xab4   :  { %v1095_v33 = vpop.f32.mrf.mxu0 }
 0xab5   :  { %v1109_v1 = vpop.f32.mrf.mxu1  ;;  %v1096_v19 = vadd.f32 %v1095_v33, %v968_v35 }
 0xab6   :  { %v1110_v40 = vadd.f32 %v1109_v1, %v969_v36 }
 0xab7   :  { %v1252_v55 = vmul.f32 0.17677669, %v1096_v19 }
 0xaba   :  { %v1081_v25 = vpop.f32.mrf.mxu3 }
 0xabb   :  { %v1082_v41 = vadd.f32 %v1081_v25, %v967_v43 }
 0xabc   :  { %v1097_v37 = vpop.f32.mrf.mxu0 }
 0xabd   :  { %v1098_v38 = vadd.f32 %v1097_v37, %v968_v35  ;;  %v1111_v39 = vpop.f32.mrf.mxu1  ;;  %v1114_v51 = vmul.f32 0.17677669, %v1082_v41 }
 0xabe   :  { %v1112_v42 = vadd.f32 %v1111_v39, %v969_v36 }
 0xabf   :  { %v2778_v44 = vpack.c.bf16 %v1098_v38, %v1096_v19  ;;  %v1253_v54 = vmul.f32 0.17677669, %v1098_v38 }
 0xac0   :  { %v1255_v45 = vpack.c.bf16 %v1112_v42, %v1110_v40 }
 0xac1   :  { %v1254_v57 = vpack.c.bf16 %v1253_v54, %v1252_v55  ;;  %v1192_v61 = vsel %vm398_vm2, %v2778_v44, 0 }
 0xac2   :  { %1314 = vmatpush.bf16.msrb.mxu1 %v1255_v45  ;;  %v1083_v46 = vpop.f32.mrf.mxu3 }
 0xac3   :  { %v1084_v48 = vadd.f32 %v1083_v46, %v967_v43 }
 0xac5   :  { %v1117_v49 = vpack.c.bf16 %v1084_v48, %v1082_v41  ;;  %v1115_v50 = vmul.f32 0.17677669, %v1084_v48 }
 0xac7   :  { %1119 = vrot.lane.b32.xlu1 %v1117_v49, %s2580_s15  ;;  %v1116_v53 = vpack.c.bf16 %v1115_v50, %v1114_v51 }
 0xacf   :  { %1186 = vrot.lane.b32.xlu1 %v1116_v53, %s2581_s1 }
 0xad7   :  { %1257 = vrot.lane.b32.xlu1 %v1254_v57, %s2575_s26 }
 0xb39   :  { %v1120_v58 = vpop.permute.xlu1 %1119 }
 0xb3a   :  { %v1125_v59 = vsel %vm398_vm2, %v1120_v58, 0 }
 0xb3b   :  { %1134 = vmatpush.bf16.xpose.msra.mxu2 %v1125_v59 }
 0xb41   :  { %v1187_v62 = vpop.permute.xlu1 %1186 }
 0xb42   :  { %2156 = vmatmul.msk.bf16.vlgmr.msra.gmra.mxu2 %vm398_vm2, %v1116_v53 }
 0xb43   :  { %1201 = vmatpush.bf16.xpose.msrb.mxu2 %v1192_v61 }
 0xb49   :  { %v1258_v36 = vpop.permute.xlu1 %1257 }
 0xb52   :  { %2158 = vmatmul.msk.bf16.vlgmr.msrb.gmra.mxu2 %vm398_vm2, %v1187_v62 }
 0xbc5   :  { %v1136_v63 = vpop.f32.mrf.mxu2 }
 0xbc6   :  { %v1137_v0 = vadd.f32 %v1136_v63, %v2664_v52 }
 0xbc8   :  { %v1141_v2 = vsel %vm419_vm3, %v1137_v0, -inf }
 0xbc9   :  { %1142 = vmax.xlane.f32.xlu0 %v1141_v2 }
 0xbcd   :  { %v1138_v3 = vpop.f32.mrf.mxu2 }
 0xbce   :  { %v1139_v4 = vadd.f32 %v1138_v3, %v2671_v56 }
 0xbd0   :  { %v1144_v5 = vsel %vm419_vm3, %v1139_v4, -inf }
 0xbd1   :  { %1145 = vmax.xlane.f32.xlu2 %v1144_v5 }
 0xbd5   :  { %v1203_v6 = vpop.f32.mrf.mxu2 }
 0xbd6   :  { %v1204_v23 = vadd.f32 %v1203_v6, %v2664_v52 }
 0xbd8   :  { %v1208_v24 = vsel %vm419_vm3, %v1204_v23, -inf }
 0xbdd   :  { %v1205_v7 = vpop.f32.mrf.mxu2 }
 0xbde   :  { %v1206_v8 = vadd.f32 %v1205_v7, %v2671_v56 }
 0xbe0   :  { %v1211_v9 = vsel %vm419_vm3, %v1206_v8, -inf }
 0xbe1   :  { %1212 = vmax.xlane.f32.xlu1 %v1211_v9 }
 0xc3c   :  { %v1143_v10 = vpop.xlane.xlu0 %1142 }
 0xc3d   :  { %v1147_v11 = vsub.f32 %v1137_v0, %v1143_v10 }
 0xc3f   :  { %v1149_v12 = vmul.f32 1.442695, %v1147_v11 }
 0xc41   :  { %2454 = vpow2.f32 %v1149_v12 }
 0xc44   :  { %v1146_v13 = vpop.xlane.xlu2 %1145 }
 0xc45   :  { %v1148_v14 = vsub.f32 %v1139_v4, %v1146_v13 }
 0xc47   :  { %v2455_v15 = vpop.eup %2454  ;;  %v1151_v16 = vmul.f32 1.442695, %v1148_v14 }
 0xc48   :  { %v1153_v17 = vsel %vm419_vm3, %v2455_v15, 0.0 }
 0xc49   :  { %2456 = vpow2.f32 %v1151_v16  ;;  %1154 = vadd.xlane.f32.xlu0 %v1153_v17 }
 0xc4f   :  { %v2457_v18 = vpop.eup %2456 }
 0xc50   :  { %v1156_v22 = vsel %vm419_vm3, %v2457_v18, 0.0 }
 0xc51   :  { %1157 = vadd.xlane.f32.xlu2 %v1156_v22 }
 0xc54   :  { %v1213_v42 = vpop.xlane.xlu1 %1212 }
 0xc55   :  { %v1215_v45 = vsub.f32 %v1206_v8, %v1213_v42 }
 0xc57   :  { %v1218_v46 = vmul.f32 1.442695, %v1215_v45 }
 0xc5d   :  { %1164 = vrot.lane.b32.xlu0 %v1117_v49, %s2575_s26 }
 0xc69   :  { %1259 = vrot.lane.b32.xlu2 %v2778_v44, %s2581_s1 }
 0xc87   :  { %1209 = vmax.xlane.f32.xlu0 %v1208_v24  ;;  %v2357_v24 = vld [vmem:[#allocation2 + $0x170] sm:$0xff] }
 0xcbc   :  { %v1155_v26 = vpop.xlane.xlu0 %1154 }
 0xcc4   :  { %v1158_v27 = vpop.xlane.xlu2 %1157 }
 0xcc5   :  { %2458 = vrcp.f32 %v1158_v27  ;;  %v2355_v27 = vld [vmem:[#allocation2 + $0x160] sm:$0xff] }
 0xcc6   :  { %2460 = vrcp.f32 %v1155_v26  ;;  %v2356_v26 = vld [vmem:[#allocation2 + $0x168] sm:$0xff] }
 0xccb   :  { %v2459_v28 = vpop.eup %2458 }
 0xccc   :  { %v2461_v29 = vpop.eup %2460  ;;  %v1162_v30 = vmul.f32 %v2459_v28, %v2457_v18  ;;  %v1260_v60 = vpop.permute.xlu2 %1259  ;;  %v2354_v28 = vld [vmem:[#allocation2 + $0x158] sm:$0xff] }
 0xccd   :  { %v1161_v33 = vmul.f32 %v2461_v29, %v2455_v15  ;;  %v1265_v34 = vsel %vm398_vm2, %v1260_v60, 0 }
 0xccf   :  { %v1165_v1 = vpop.permute.xlu0 %1164  ;;  %v1163_v35 = vpack.c.bf16 %v1162_v30, %v1161_v33  ;;  %v2353_v33 = vld [vmem:[#allocation2 + $0x150] sm:$0xff] }
 0xcd0   :  { %1177 = vmatpush.bf16.msra.mxu3 %v1165_v1 }
 0xcd3   :  { %2157 = vmatmul.msk.bf16.vlgmr.msra.gmra.mxu3 %vm419_vm3, %v1163_v35 }
 0xcd4   :  { %1274 = vmatpush.bf16.xpose.msrb.mxu3 %v1265_v34 }
 0xce3   :  { %2160 = vmatmul.msk.bf16.vlgmr.msrb.gmra.mxu3 %vm398_vm2, %v1258_v36 }
 0xcfa   :  { %v1210_v25 = vpop.xlane.xlu0 %1209 }
 0xcfb   :  { %v1214_v37 = vsub.f32 %v1204_v23, %v1210_v25  ;;  %v2358_v23 = vld [vmem:[#allocation2 + $0x178] sm:$0xff] }
 0xcfc   :  { %1397 = vmatpush.bf16.msra.mxu0 %v2358_v23 }
 0xcfd   :  { %v1216_v19 = vmul.f32 1.442695, %v1214_v37 }
 0xcff   :  { %2462 = vpow2.f32 %v1216_v19 }
 0xd00   :  { %2464 = vpow2.f32 %v1218_v46  ;;  %1398 = vmatpush.bf16.msra.mxu0 %v2357_v24  ;;  %v1355_v46 = vld [vmem:[%s2907_s4 + $0x1f] ss:$0 sm:$0xff] }
 0xd04   :  { %1399 = vmatpush.bf16.msra.mxu0 %v2356_v26 }
 0xd05   :  { %v2463_v38 = vpop.eup %2462 }
 0xd06   :  { %v1220_v39 = vsel %vm419_vm3, %v2463_v38, 0.0  ;;  %v2465_v50 = vpop.eup %2464 }
 0xd07   :  { %1221 = vadd.xlane.f32.xlu1 %v1220_v39  ;;  %v1223_v55 = vsel %vm419_vm3, %v2465_v50, 0.0 }
 0xd08   :  { %1400 = vmatpush.bf16.msra.mxu0 %v2355_v27 }
 0xd0c   :  { %1401 = vmatpush.bf16.msra.mxu0 %v2354_v28 }
 0xd10   :  { %1402 = vmatpush.bf16.msra.mxu0 %v2353_v33 }
 0xd56   :  { %v2805_v40 = vpop.f32.mrf.mxu3 }
 0xd5e   :  { %v2807_v43 = vpop.f32.mrf.mxu3 }
 0xd66   :  { %v1276_v41 = vpop.f32.mrf.mxu3 }
 0xd67   :  { %v1277_v48 = vadd.f32 %v1276_v41, %v2664_v52 }
 0xd69   :  { %v1281_v49 = vsel %vm419_vm3, %v1277_v48, -inf }
 0xd6a   :  { %1282 = vmax.xlane.f32.xlu2 %v1281_v49 }
 0xd6e   :  { %v1278_v51 = vpop.f32.mrf.mxu3 }
 0xd6f   :  { %v1279_v53 = vadd.f32 %v1278_v51, %v2671_v56 }
 0xd71   :  { %v1284_v54 = vsel %vm419_vm3, %v1279_v53, -inf }
 0xd72   :  { %1285 = vmax.xlane.f32.xlu0 %v1284_v54  ;;  %1224 = vadd.xlane.f32.xlu2 %v1223_v55 }
 0xd7a   :  { %v1222_v59 = vpop.xlane.xlu1 %1221 }
 0xd8a   :  { %1232 = vrot.lane.b32.xlu2 %v2778_v44, %s2580_s15 }
 0xddd   :  { %v1283_v57 = vpop.xlane.xlu2 %1282 }
 0xdde   :  { %v1287_v58 = vsub.f32 %v1277_v48, %v1283_v57 }
 0xde0   :  { %v1289_v52 = vmul.f32 1.442695, %v1287_v58 }
 0xde2   :  { %2466 = vpow2.f32 %v1289_v52 }
 0xde3   :  { %2468 = vrcp.f32 %v1222_v59 }
 0xde5   :  { %v1225_v61 = vpop.xlane.xlu2 %1224  ;;  %v1286_v62 = vpop.xlane.xlu0 %1285 }
 0xde6   :  { %2470 = vrcp.f32 %v1225_v61  ;;  %v1288_v63 = vsub.f32 %v1279_v53, %v1286_v62 }
 0xde8   :  { %v2467_v56 = vpop.eup %2466  ;;  %v1291_v0 = vmul.f32 1.442695, %v1288_v63 }
 0xde9   :  { %v1293_v2 = vsel %vm419_vm3, %v2467_v56, 0.0  ;;  %v2469_v3 = vpop.eup %2468 }
 0xdea   :  { %2472 = vpow2.f32 %v1291_v0  ;;  %1294 = vadd.xlane.f32.xlu0 %v1293_v2  ;;  %v1228_v5 = vmul.f32 %v2469_v3, %v2463_v38  ;;  %v2362_v0 = vld [vmem:[#allocation2 + $0x198] sm:$0xff]  ;;  %v2361_v2 = vld [vmem:[#allocation2 + $0x190] sm:$0xff]  ;;  %v2360_v3 = vld [vmem:[#allocation2 + $0x188] sm:$0xff] }
 0xdec   :  { %v2471_v4 = vpop.eup %2470 }
 0xded   :  { %v1229_v44 = vmul.f32 %v2471_v4, %v2465_v50  ;;  %v1233_v6 = vpop.permute.xlu2 %1232 }
 0xdee   :  { %1245 = vmatpush.bf16.msra.mxu2 %v1233_v6  ;;  %v2359_v6 = vld [vmem:[#allocation2 + $0x180] sm:$0xff] }
 0xdef   :  { %v1230_v7 = vpack.c.bf16 %v1229_v44, %v1228_v5 }
 0xdf0   :  { %v2473_v8 = vpop.eup %2472 }
 0xdf1   :  { %2159 = vmatmul.msk.bf16.vlgmr.msra.gmra.mxu2 %vm419_vm3, %v1230_v7  ;;  %v1296_v9 = vsel %vm419_vm3, %v2473_v8, 0.0  ;;  %v2370_v7 = vld [vmem:[#allocation2 + $0x1d8] sm:$0xff] }
 0xdf2   :  { %1297 = vadd.xlane.f32.xlu1 %v1296_v9  ;;  %1587 = vmatpush.bf16.msra.mxu3 %v2370_v7  ;;  %v2374_v7 = vld [vmem:[#allocation2 + $0x78] sm:$0xff] }
 0xe5d   :  { %v1295_v10 = vpop.xlane.xlu0 %1294 }
 0xe5e   :  { %2474 = vrcp.f32 %v1295_v10  ;;  %v2369_v10 = vld [vmem:[#allocation2 + $0x1d0] sm:$0xff] }
 0xe5f   :  { %1588 = vmatpush.bf16.msra.mxu3 %v2369_v10 }
 0xe64   :  { %v2475_v12 = vpop.eup %2474 }
 0xe65   :  { %v1298_v11 = vpop.xlane.xlu1 %1297  ;;  %v1301_v14 = vmul.f32 %v2475_v12, %v2467_v56  ;;  %v2363_v56 = vld [vmem:[#allocation2 + $0x1a0] sm:$0xff] }
 0xe66   :  { %2476 = vrcp.f32 %v1298_v11 }
 0xe6c   :  { %v2477_v13 = vpop.eup %2476 }
 0xe6d   :  { %v1302_v15 = vmul.f32 %v2477_v13, %v2473_v8 }
 0xe6f   :  { %v1303_v16 = vpack.c.bf16 %v1302_v15, %v1301_v14 }
 0xe71   :  { %2161 = vmatmul.msk.bf16.vlgmr.msrb.gmra.mxu1 %vm419_vm3, %v1303_v16 }
 0xe74   :  { %v1247_v17 = vpop.f32.mrf.mxu2 }
 0xe7c   :  { %v1249_v18 = vpop.f32.mrf.mxu2 }
 0xe7d   :  { %v2407_v22 = vpack.i.bf16 %v1249_v18, %v1247_v17 }
 0xe7f   :  { %2408 = vrot.lane.b32.xlu0 %v2407_v22, %s2581_s1 }
 0xeee   :  { %v1316_v29 = vpop.f32.mrf.mxu1 }
 0xef1   :  { %v2409_v1 = vpop.permute.xlu0 %2408 }
 0xef2   :  { %v2411_v34 = vunpack.i.h.bf16 %v2409_v1  ;;  %v2410_v35 = vunpack.i.l.bf16 %v2409_v1 }
 0xef4   :  { %v1338_v19 = vsel %vm398_vm2, %v2807_v43, %v2411_v34  ;;  %v1337_v38 = vsel %vm398_vm2, %v2805_v40, %v2410_v35  ;;  %v1412_v34 = vld [vmem:[%s2907_s4 + $0x31] ss:$0 sm:$0xff] }
 0xef6   :  { %v1318_v30 = vpop.f32.mrf.mxu1 }
 0xef7   :  { %v2412_v60 = vpack.i.bf16 %v1318_v30, %v1316_v29  ;;  %v1411_v29 = vld [vmem:[%s2907_s4 + $0x30] ss:$0 sm:$0xff] }
 0xef9   :  { %2413 = vrot.lane.b32.xlu1 %v2412_v60, %s2575_s26 }
 0xf6b   :  { %v2414_v36 = vpop.permute.xlu1 %2413 }
 0xf6c   :  { %v2416_v25 = vunpack.i.h.bf16 %v2414_v36  ;;  %v2415_v37 = vunpack.i.l.bf16 %v2414_v36 }
 0xf6e   :  { %v1339_v39 = vsel %vm618_vm4, %v1337_v38, %v2415_v37  ;;  %v1340_v42 = vsel %vm618_vm4, %v1338_v19, %v2416_v25  ;;  %v2368_v19 = vld [vmem:[#allocation2 + $0x1c8] sm:$0xff]  ;;  %v2367_v38 = vld [vmem:[#allocation2 + $0x1c0] sm:$0xff] }
 0xf6f   :  { %v1341_v45 = vpack.c.bf16 %v1340_v42, %v1339_v39  ;;  %1589 = vmatpush.bf16.msra.mxu3 %v2368_v19  ;;  %v2366_v39 = vld [vmem:[#allocation2 + $0x1b8] sm:$0xff]  ;;  %v2365_v42 = vld [vmem:[#allocation2 + $0x1b0] sm:$0xff] }
 0xf71   :  { %2186 = vmatmul.msk.bf16.vlgmr.msra.gmra.mxu0 %vm126_vm0, %v1341_v45 }
 0xf73   :  { %1590 = vmatpush.bf16.msra.mxu3 %v2367_v38 }
 0xf77   :  { %1591 = vmatpush.bf16.msra.mxu3 %v2366_v39 }
 0xf7b   :  { %1592 = vmatpush.bf16.msra.mxu3 %v2365_v42 }
 0xfee   :  { %v1404_v41 = vpop.f32.mrf.mxu0 }
 0xfef   :  { %v1405_v48 = vadd.f32 %v1404_v41, %v1355_v46 }
 0xff1   :  { %v1409_v49 = vadd.f32 %v1405_v48, %v2766_v31 }
 0xff3   :  { %v1413_v43 = vsel %vm126_vm0, %v1409_v49, 0.0 }
 0xff4   :  { %1414 = vadd.xlane.f32.xlu0 %v1413_v43 }
 0xff6   :  { %v1406_v50 = vpop.f32.mrf.mxu0 }
 0xff7   :  { %v1407_v40 = vadd.f32 %v1406_v50, %v1355_v46  ;;  %v1475_v46 = vld [vmem:[%s2907_s4 + $0x32] ss:$0 sm:$0xff] }
 0xff9   :  { %v1410_v51 = vadd.f32 %v1407_v40, %v2768_v32  ;;  %v2364_v32 = vld [vmem:[#allocation2 + $0x1a8] sm:$0xff] }
 0xffa   :  { %1517 = vmatpush.bf16.msrb.mxu2 %v2364_v32 }
 0xffb   :  { %v1416_v53 = vsel %vm126_vm0, %v1410_v51, 0.0 }
 0xffc   :  { %1417 = vadd.xlane.f32.xlu2 %v1416_v53 }
 0xffe   :  { %1518 = vmatpush.bf16.msrb.mxu2 %v2363_v56 }
0x1002   :  { %1519 = vmatpush.bf16.msrb.mxu2 %v2362_v0 }
0x1006   :  { %1520 = vmatpush.bf16.msrb.mxu2 %v2361_v2 }
0x100a   :  { %1521 = vmatpush.bf16.msrb.mxu2 %v2360_v3 }
0x100e   :  { %1522 = vmatpush.bf16.msrb.mxu2 %v2359_v6  ;;  %v2375_v6 = vld [vmem:[#allocation2 + $0x80] sm:$0xff] }
0x1067   :  { %v1415_v54 = vpop.xlane.xlu0 %1414 }
0x1068   :  { %v1419_v55 = vmul.f32 %v1415_v54, %v2720_v47 }
0x106a   :  { %v1421_v57 = vsub.f32 %v1409_v49, %v1419_v55 }
0x106c   :  { %v1423_v58 = vmul.f32 %v1421_v57, %v1421_v57 }
0x106e   :  { %v1425_v52 = vsel %vm126_vm0, %v1423_v58, 0.0 }
0x106f   :  { %v1418_v59 = vpop.xlane.xlu2 %1417  ;;  %1426 = vadd.xlane.f32.xlu1 %v1425_v52 }
0x1070   :  { %v1420_v31 = vmul.f32 %v1418_v59, %v2720_v47 }
0x1072   :  { %v1422_v61 = vsub.f32 %v1410_v51, %v1420_v31  ;;  %v1545_v51 = vld [vmem:[%s2907_s4 + $0x33] ss:$0 sm:$0xff] }
0x1074   :  { %v1424_v62 = vmul.f32 %v1422_v61, %v1422_v61 }
0x1076   :  { %v1428_v63 = vsel %vm126_vm0, %v1424_v62, 0.0 }
0x1077   :  { %1429 = vadd.xlane.f32.xlu0 %v1428_v63 }
0x10e2   :  { %v1427_v4 = vpop.xlane.xlu1 %1426 }
0x10e3   :  { %v1431_v5 = vmul.f32 %v1427_v4, %v2720_v47 }
0x10e5   :  { %v1433_v44 = vadd.f32 1e-05, %v1431_v5 }
0x10e7   :  { %2478 = vrsqrt.f32 %v1433_v44  ;;  %vm1441_vm3 = vweird.f32 %v1433_v44 }
0x10ea   :  { %v1430_v8 = vpop.xlane.xlu0 %1429 }
0x10eb   :  { %v1432_v9 = vmul.f32 %v1430_v8, %v2720_v47  ;;  %v2373_v8 = vld [vmem:[#allocation2 + $0x70] sm:$0xff] }
0x10ed   :  { %v2479_v11 = vpop.eup %2478  ;;  %v1434_v12 = vadd.f32 1e-05, %v1432_v9 }
0x10ee   :  { %v1436_v13 = vmul.f32 %v2479_v11, %v1433_v44  ;;  %vm1442_vm2 = vweird.f32 %v2479_v11  ;;  %v2376_v44 = vld [vmem:[#allocation2 + $0x88] sm:$0xff] }
0x10ef   :  { %2480 = vrsqrt.f32 %v1434_v12  ;;  %vm1443_vm4 = vmor %vm1441_vm3, %vm1442_vm2  ;;  %vm1451_vm7 = vweird.f32 %v1434_v12  ;;  %1709 = vmatpush.bf16.msra.mxu1 %v2376_v44 }
0x10f0   :  { %v1437_v14 = vmul.f32 %v2479_v11, %v1436_v13  ;;  %v2371_v13 = vld [vmem:[#allocation2 + $0x60] sm:$0xff] }
0x10f2   :  { %v1438_v15 = vmul.f32 0.5, %v1437_v14 }
0x10f3   :  { %1710 = vmatpush.bf16.msra.mxu1 %v2375_v6 }
0x10f4   :  { %v1439_v16 = vsub.f32 1.5, %v1438_v15 }
0x10f5   :  { %v2481_v17 = vpop.eup %2480 }
0x10f6   :  { %v1440_v18 = vmul.f32 %v2479_v11, %v1439_v16  ;;  %v1446_v22 = vmul.f32 %v2481_v17, %v1434_v12  ;;  %vm1452_vm6 = vweird.f32 %v2481_v17 }
0x10f7   :  { %vm1453_vm8 = vmor %vm1451_vm7, %vm1452_vm6  ;;  %1711 = vmatpush.bf16.msra.mxu1 %v2374_v7 }
0x10f8   :  { %v1447_v23 = vmul.f32 %v2481_v17, %v1446_v22  ;;  %v1444_v24 = vsel %vm1443_vm4, %v2479_v11, %v1440_v18  ;;  %v2372_v11 = vld [vmem:[#allocation2 + $0x68] sm:$0xff] }
0x10f9   :  { %v1455_v28 = vmul.f32 %v1444_v24, %v1421_v57 }
0x10fa   :  { %v1448_v26 = vmul.f32 0.5, %v1447_v23 }
0x10fb   :  { %v1457_v33 = vmul.f32 %v1455_v28, %v1411_v29  ;;  %1712 = vmatpush.bf16.msra.mxu1 %v2373_v8 }
0x10fc   :  { %v1449_v27 = vsub.f32 1.5, %v1448_v26 }
0x10fd   :  { %v1459_v36 = vadd.f32 %v1457_v33, %v1412_v34 }
0x10fe   :  { %v1450_v30 = vmul.f32 %v2481_v17, %v1449_v27 }
0x10ff   :  { %1713 = vmatpush.bf16.msra.mxu1 %v2372_v11  ;;  %v1753_v11 = vld [vmem:[%s2907_s4 + $0x3] ss:$0 sm:$0xff] }
0x1100   :  { %v1454_v60 = vsel %vm1453_vm8, %v2481_v17, %v1450_v30 }
0x1101   :  { %v1456_v1 = vmul.f32 %v1454_v60, %v1422_v61 }
0x1103   :  { %v1458_v35 = vmul.f32 %v1456_v1, %v1411_v29  ;;  %1714 = vmatpush.bf16.msra.mxu1 %v2371_v13 }
0x1105   :  { %v1460_v25 = vadd.f32 %v1458_v35, %v1412_v34 }
0x1107   :  { %v1461_v37 = vpack.c.bf16 %v1460_v25, %v1459_v36 }
0x1109   :  { %2211 = vmatmul.msk.bf16.vlgmr.msrb.gmra.mxu2 %vm126_vm0, %v1461_v37 }
0x118c   :  { %v1524_v45 = vpop.f32.mrf.mxu2 }
0x118d   :  { %v1525_v41 = vadd.f32 %v1524_v45, %v1475_v46 }
0x118f   :  { %v1529_v43 = vmax.f32 %v1525_v41, 0.0  ;;  %v2382_v41 = vld [vmem:[#allocation2 + $0xb8] sm:$0xff] }
0x1190   :  { %1795 = vmatpush.bf16.msrb.mxu0 %v2382_v41 }
0x1194   :  { %v1526_v48 = vpop.f32.mrf.mxu2 }
0x1195   :  { %v1527_v49 = vadd.f32 %v1526_v48, %v1475_v46  ;;  %v2381_v48 = vld [vmem:[#allocation2 + $0xb0] sm:$0xff] }
0x1196   :  { %1796 = vmatpush.bf16.msrb.mxu0 %v2381_v48 }
0x1197   :  { %v1530_v50 = vmax.f32 %v1527_v49, 0.0  ;;  %v2380_v49 = vld [vmem:[#allocation2 + $0xa8] sm:$0xff] }
0x1199   :  { %v1531_v40 = vpack.c.bf16 %v1530_v50, %v1529_v43  ;;  %v2379_v43 = vld [vmem:[#allocation2 + $0xa0] sm:$0xff]  ;;  %v2378_v50 = vld [vmem:[#allocation2 + $0x98] sm:$0xff] }
0x119a   :  { %1797 = vmatpush.bf16.msrb.mxu0 %v2380_v49 }
0x119b   :  { %2236 = vmatmul.msk.bf16.vlgmr.msra.gmra.mxu3 %vm126_vm0, %v1531_v40  ;;  %v2377_v40 = vld [vmem:[#allocation2 + $0x90] sm:$0xff] }
0x119e   :  { %1798 = vmatpush.bf16.msrb.mxu0 %v2379_v43 }
0x11a2   :  { %1799 = vmatpush.bf16.msrb.mxu0 %v2378_v50  ;;  %v1834_v50 = vld [vmem:[%s2907_s4 + $0x5] ss:$0 sm:$0xff] }
0x11a6   :  { %1800 = vmatpush.bf16.msrb.mxu0 %v2377_v40 }
0x121e   :  { %v1594_v53 = vpop.f32.mrf.mxu3 }
0x121f   :  { %v1595_v54 = vadd.f32 %v1594_v53, %v1545_v51 }
0x1221   :  { %v1599_v55 = vadd.f32 %v1595_v54, %v1459_v36  ;;  %v1602_v36 = vld [vmem:[%s2907_s4 + $0x35] ss:$0 sm:$0xff] }
0x1223   :  { %v1603_v57 = vsel %vm126_vm0, %v1599_v55, 0.0 }
0x1224   :  { %1604 = vadd.xlane.f32.xlu2 %v1603_v57 }
0x1226   :  { %v1596_v58 = vpop.f32.mrf.mxu3 }
0x1227   :  { %v1597_v52 = vadd.f32 %v1596_v58, %v1545_v51  ;;  %v1667_v51 = vld [vmem:[%s2907_s4 + $0x2] ss:$0 sm:$0xff] }
0x1229   :  { %v1600_v59 = vadd.f32 %v1597_v52, %v1460_v25 }
0x122b   :  { %v1606_v31 = vsel %vm126_vm0, %v1600_v59, 0.0 }
0x122c   :  { %1607 = vadd.xlane.f32.xlu0 %v1606_v31 }
0x1297   :  { %v1605_v61 = vpop.xlane.xlu2 %1604 }
0x1298   :  { %v1609_v62 = vmul.f32 %v1605_v61, %v2720_v47 }
0x129a   :  { %v1611_v63 = vsub.f32 %v1599_v55, %v1609_v62 }
0x129c   :  { %v1613_v32 = vmul.f32 %v1611_v63, %v1611_v63 }
0x129e   :  { %v1615_v56 = vsel %vm126_vm0, %v1613_v32, 0.0 }
0x129f   :  { %v1608_v0 = vpop.xlane.xlu0 %1607  ;;  %1616 = vadd.xlane.f32.xlu1 %v1615_v56 }
0x12a0   :  { %v1610_v2 = vmul.f32 %v1608_v0, %v2720_v47 }
0x12a2   :  { %v1612_v3 = vsub.f32 %v1600_v59, %v1610_v2 }
0x12a4   :  { %v1614_v4 = vmul.f32 %v1612_v3, %v1612_v3 }
0x12a6   :  { %v1618_v5 = vsel %vm126_vm0, %v1614_v4, 0.0 }
0x12a7   :  { %1619 = vadd.xlane.f32.xlu2 %v1618_v5 }
0x1312   :  { %v1617_v9 = vpop.xlane.xlu1 %1616 }
0x1313   :  { %v1621_v10 = vmul.f32 %v1617_v9, %v2720_v47 }
0x1315   :  { %v1623_v12 = vadd.f32 1e-05, %v1621_v10  ;;  %v2494_v10 = vld [vmem:[%s2903_s0] sm:$0xff] }
0x1316   :  { %61 = vrot.lane.b32.xlu2 %v2494_v10, %s2583_s27 }
0x1317   :  { %2482 = vrsqrt.f32 %v1623_v12  ;;  %vm1631_vm10 = vweird.f32 %v1623_v12 }
0x131a   :  { %v1620_v14 = vpop.xlane.xlu2 %1619 }
0x131b   :  { %v1622_v15 = vmul.f32 %v1620_v14, %v2720_v47  ;;  %v1601_v47 = vld [vmem:[%s2907_s4 + $0x34] ss:$0 sm:$0xff] }
0x131d   :  { %v2483_v16 = vpop.eup %2482  ;;  %v1624_v17 = vadd.f32 1e-05, %v1622_v15 }
0x131e   :  { %v1626_v18 = vmul.f32 %v2483_v16, %v1623_v12  ;;  %vm1632_vm9 = vweird.f32 %v2483_v16 }
0x131f   :  { %2484 = vrsqrt.f32 %v1624_v17  ;;  %vm1633_vm11 = vmor %vm1631_vm10, %vm1632_vm9  ;;  %vm1641_vm13 = vweird.f32 %v1624_v17 }
0x1320   :  { %v1627_v22 = vmul.f32 %v2483_v16, %v1626_v18 }
0x1322   :  { %v1628_v23 = vmul.f32 0.5, %v1627_v22 }
0x1324   :  { %v1629_v24 = vsub.f32 1.5, %v1628_v23 }
0x1325   :  { %v2485_v26 = vpop.eup %2484 }
0x1326   :  { %v1630_v27 = vmul.f32 %v2483_v16, %v1629_v24  ;;  %v1636_v28 = vmul.f32 %v2485_v26, %v1624_v17  ;;  %vm1642_vm12 = vweird.f32 %v2485_v26 }
0x1327   :  { %vm1643_vm14 = vmor %vm1641_vm13, %vm1642_vm12 }
0x1328   :  { %v1634_v29 = vsel %vm1633_vm11, %v2483_v16, %v1630_v27  ;;  %v1637_v30 = vmul.f32 %v2485_v26, %v1636_v28 }
0x1329   :  { %v1645_v33 = vmul.f32 %v1634_v29, %v1611_v63 }
0x132a   :  { %v1638_v60 = vmul.f32 0.5, %v1637_v30 }
0x132b   :  { %v1647_v35 = vmul.f32 %v1645_v33, %v1601_v47 }
0x132c   :  { %v1639_v1 = vsub.f32 1.5, %v1638_v60 }
0x132d   :  { %v1649_v19 = vadd.f32 %v1647_v35, %v1602_v36 }
0x132e   :  { %v1640_v34 = vmul.f32 %v2485_v26, %v1639_v1 }
0x132f   :  { %v1651_v42 = vadd.f32 %v1649_v19, %v2640_v20 }
0x1330   :  { %v1644_v25 = vsel %vm1643_vm14, %v2485_v26, %v1640_v34 }
0x1331   :  { %v1646_v37 = vmul.f32 %v1644_v25, %v1612_v3 }
0x1333   :  { %v1648_v38 = vmul.f32 %v1646_v37, %v1601_v47  ;;  %v1825_v47 = vld [vmem:[%s2907_s4 + $0x4] ss:$0 sm:$0xff]  ;;  %s2586_s4 = smov 128  }
0x1335   :  { %v1650_v39 = vadd.f32 %v1648_v38, %v1602_v36 }
0x1337   :  { %v1652_v45 = vadd.f32 %v1650_v39, %v2642_v21  ;;  %v2495_v39 = vld [vmem:[%s2903_s0 + $0x8] sm:$0xff]  ;;  %s2585_s0 = smov [#allocation7]  }
0x1338   :  { %s1857_s9 = sshll.u32 %s2585_s0, 4  ;;  %s1858_s9 = int_to_ptr.vmem [resolvable:$true] %s1857_s9 }
0x1339   :  { %v1653_v46 = vpack.c.bf16 %v1652_v45, %v1651_v42 }
0x133b   :  { %2261 = vmatmul.msk.bf16.vlgmr.msra.gmra.mxu1 %vm126_vm0, %v1653_v46  ;;  %v2584_v46 = vmov 0  }
0x133c   :  { %2417 = vset.pattern.permute.xlu1 %v2584_v46  ;;  %2418 = vset.pattern.permute.xlu2 %v2584_v46 }
0x133d   :  { %2419 = vset.pattern.permute.xlu0 %v2584_v46 }
0x1370   :  { %v62_v42 = vpop.permute.xlu2 %61 }
0x1371   :  { %v68_v45 = vsel %vm67_vm15, %v62_v42, 0.0 }
0x1372   :  { %69 = vadd.xlane.f32.xlu1 %v68_v45 }
0x13b8   :  { %v1716_v53 = vpop.f32.mrf.mxu1 }
0x13b9   :  { %v1717_v54 = vadd.f32 %v1716_v53, %v1667_v51 }
0x13bb   :  { %v1723_v55 = vmul.f32 0.044715, %v1717_v54  ;;  %v1721_v5 = vmul.f32 0.5, %v1717_v54 }
0x13bd   :  { %v1725_v57 = vmul.f32 %v1723_v55, %v1717_v54 }
0x13bf   :  { %v1727_v58 = vmul.f32 %v1725_v57, %v1717_v54 }
0x13c0   :  { %v1718_v52 = vpop.f32.mrf.mxu1 }
0x13c1   :  { %v1729_v59 = vadd.f32 %v1727_v58, %v1717_v54  ;;  %v1719_v31 = vadd.f32 %v1718_v52, %v1667_v51 }
0x13c3   :  { %v1724_v61 = vmul.f32 0.044715, %v1719_v31  ;;  %v1731_v62 = vmul.f32 0.7978846, %v1729_v59  ;;  %v1722_v44 = vmul.f32 0.5, %v1719_v31 }
0x13c5   :  { %v1726_v63 = vmul.f32 %v1724_v61, %v1719_v31  ;;  %2486 = vtanh.f32 %v1731_v62 }
0x13c7   :  { %v1728_v32 = vmul.f32 %v1726_v63, %v1719_v31 }
0x13c9   :  { %v1730_v56 = vadd.f32 %v1728_v32, %v1719_v31 }
0x13cb   :  { %v1732_v0 = vmul.f32 0.7978846, %v1730_v56  ;;  %v2487_v2 = vpop.eup %2486 }
0x13cc   :  { %v1735_v3 = vadd.f32 1.0, %v2487_v2 }
0x13cd   :  { %2488 = vtanh.f32 %v1732_v0 }
0x13ce   :  { %v1737_v7 = vmul.f32 %v1735_v3, %v1721_v5 }
0x13d3   :  { %v2489_v4 = vpop.eup %2488 }
0x13d4   :  { %v1736_v6 = vadd.f32 1.0, %v2489_v4 }
0x13d6   :  { %v1738_v8 = vmul.f32 %v1736_v6, %v1722_v44 }
0x13d8   :  { %v1739_v9 = vpack.c.bf16 %v1738_v8, %v1737_v7 }
0x13da   :  { %2286 = vmatmul.msk.bf16.vlgmr.msrb.gmra.mxu0 %vm126_vm0, %v1739_v9 }
0x13e5   :  { %v70_v51 = vpop.xlane.xlu1 %69 }
0x1457   :  { %v1802_v12 = vpop.f32.mrf.mxu0 }
0x1458   :  { %v1803_v13 = vadd.f32 %v1802_v12, %v1753_v11 }
0x145a   :  { %v1809_v14 = vmul.f32 0.044715, %v1803_v13  ;;  %v1807_v60 = vmul.f32 0.5, %v1803_v13 }
0x145c   :  { %v1811_v15 = vmul.f32 %v1809_v14, %v1803_v13 }
0x145e   :  { %v1813_v16 = vmul.f32 %v1811_v15, %v1803_v13 }
0x145f   :  { %v1804_v17 = vpop.f32.mrf.mxu0 }
0x1460   :  { %v1805_v18 = vadd.f32 %v1804_v17, %v1753_v11  ;;  %v1815_v22 = vadd.f32 %v1813_v16, %v1803_v13 }
0x1462   :  { %v1810_v23 = vmul.f32 0.044715, %v1805_v18  ;;  %v1817_v24 = vmul.f32 0.7978846, %v1815_v22  ;;  %v1808_v25 = vmul.f32 0.5, %v1805_v18 }
0x1464   :  { %v1812_v26 = vmul.f32 %v1810_v23, %v1805_v18  ;;  %2490 = vtanh.f32 %v1817_v24 }
0x1466   :  { %v1814_v27 = vmul.f32 %v1812_v26, %v1805_v18 }
0x1468   :  { %v1816_v28 = vadd.f32 %v1814_v27, %v1805_v18 }
0x146a   :  { %v2491_v29 = vpop.eup %2490  ;;  %v1818_v30 = vmul.f32 0.7978846, %v1816_v28 }
0x146b   :  { %v1821_v33 = vadd.f32 1.0, %v2491_v29 }
0x146c   :  { %2492 = vtanh.f32 %v1818_v30 }
0x146d   :  { %v1823_v1 = vmul.f32 %v1821_v33, %v1807_v60 }
0x146f   :  { %v1826_v34 = vmul.f32 %v1825_v47, %v1823_v1 }
0x1471   :  { %v1828_v35 = vsel %vm126_vm0, %v1826_v34, 0.0 }
0x1472   :  { %v2493_v36 = vpop.eup %2492  ;;  %1829 = vadd.xlane.f32.xlu0 %v1828_v35 }
0x1473   :  { %v1822_v37 = vadd.f32 1.0, %v2493_v36 }
0x1475   :  { %v1824_v19 = vmul.f32 %v1822_v37, %v1808_v25 }
0x1477   :  { %v1827_v38 = vmul.f32 %v1825_v47, %v1824_v19 }
0x1479   :  { %v1831_v43 = vsel %vm126_vm0, %v1827_v38, 0.0 }
0x1486   :  { %63 = vrot.lane.b32.xlu0 %v2495_v39, %s2583_s27 }
0x14e5   :  { %v1830_v41 = vpop.xlane.xlu0 %1829 }
0x14e6   :  { %v1835_v40 = vadd.f32 %v1834_v50, %v1830_v41 }
0x14f8   :  { %v64_v48 = vpop.permute.xlu0 %63 }
0x14f9   :  { %v71_v49 = vsel %vm67_vm15, %v64_v48, 0.0 }
0x14fa   :  { %72 = vadd.xlane.f32.xlu1 %v71_v49 }
0x1502   :  { %1832 = vadd.xlane.f32.xlu1 %v1831_v43 }
0x151b   :  { %1839 = vperm.xlu1 %2417, %v1835_v40  }
0x156d   :  { %v73_v53 = vpop.xlane.xlu1 %72 }
0x1575   :  { %v1833_v54 = vpop.xlane.xlu1 %1832 }
0x1576   :  { %v1836_v55 = vadd.f32 %v1834_v50, %v1833_v54 }
0x1578   :  { %1844 = vperm.xlu2 %2418, %v1836_v55  }
0x158d   :  { %v1840_v57 = vpop.permute.xlu1 %1839 }
0x158e   :  { %v1847_v58 = vmul.f32 %v1840_v57, %v2640_v20 }
0x1590   :  { %v1849_v52 = vadd.f32 %v1847_v58, %v70_v51 }
0x1592   :  { %1851 = vst.msk [vmem:[#allocation7] sm:$0xff] %vm126_vm0, %v1849_v52 }
0x15d2   :  { %v1845_v59 = vpop.permute.xlu2 %1844 }
0x15d3   :  { %v1848_v31 = vmul.f32 %v1845_v59, %v2642_v21 }
0x15d5   :  { %v1850_v61 = vadd.f32 %v1848_v31, %v73_v53 }
0x15d7   :  { %1852 = vst.msk [vmem:[#allocation7 + $0x8] sm:$0xff] %vm126_vm0, %v1850_v61 }
0x15d8   :  { %1865 = dma.vmem_to_hbm [thread:$0]  %s1858_s9, 256, %s1860_s11, [#allocation4], %s2586_s4, %s2586_s4, %s2587_s12  }
0x15d9   :  { %2572 = dma.done.wait [#allocation4], 256  }
0x15da   :  { %2573 = vsyncadd [#allocation4], 4294967040 }
0x15db   :  { %1870 = vsyncpa [#allocation3], 1 }
0x15dc   :  { %1871 = vsyncpa [#allocation6], 1 }
0x15dd   :  { %1872 = vsyncpa [#allocation4], 1 }

</bundles_post_ra>
